<compile_context>
chip_gen: v5e
topology: v5e:2x2
jax: 0.10.0
libtpu: 0.0.40
codegen_flags: <defaults>
</compile_context>

<pallas_src>
import functools

import jax
import jax.numpy as jnp
from jax.experimental import pallas as pl
from jax.experimental.pallas import tpu as pltpu

# Module hyper-parameters (input_dim comes from a tfidf vectorizer in the original
# script; we pick a small deterministic value here).
INPUT_DIM = 512
HIDDEN_DIM = 256
OUTPUT_DIM = 7
OUT_PAD = 128          # lane-dense padded output width (multiple of 128)


def _round_up(x, m):
    return ((x + m - 1) // m) * m


def mlp_kernel(x_ref, w1_ref, b1_ref, w2_ref, b2_ref, w3_ref, b3_ref, o_ref):
    """Fused 3-layer MLP forward for one batch tile (everything resident in VMEM).

    x/weights are bf16 (MXU inputs); accumulation, bias-add and ReLU are f32.
    The tile is split into two independent row-halves (straight-line unrolled) so the
    MXU work of one half overlaps the VPU epilogue of the other.
    """
    w1 = w1_ref[...]
    b1 = b1_ref[...]
    w2 = w2_ref[...]
    b2 = b2_ref[...]
    w3 = w3_ref[...]
    b3 = b3_ref[...]

    tm = o_ref.shape[0]
    n_split = 2 if (tm % 16 == 0 and tm >= 16) else 1
    half = tm // n_split

    for h in range(n_split):
        rows = slice(h * half, (h + 1) * half)
        x = x_ref[rows, :]                                                  # (half, in) bf16

        # Layer 1: Linear(input_dim, hidden_dim) + ReLU   (Dropout(0.5) = identity, eval)
        h1 = jnp.dot(x, w1, preferred_element_type=jnp.float32)            # MXU, f32 acc
        h1 = jnp.maximum(h1 + b1, 0.0)                                      # VPU, f32

        # Layer 2: Linear(hidden_dim, hidden_dim//2) + ReLU  (Dropout(0.3) = identity, eval)
        h2 = jnp.dot(h1.astype(jnp.bfloat16), w2, preferred_element_type=jnp.float32)
        h2 = jnp.maximum(h2 + b2, 0.0)

        # Layer 3: Linear(hidden_dim//2, output_dim_padded)  (padded to 128 lanes)
        out = jnp.dot(h2.astype(jnp.bfloat16), w3, preferred_element_type=jnp.float32) + b3
        o_ref[rows, :] = out.astype(o_ref.dtype)                            # full-width vst


def prepare_params(w1, b1, w2, b2, w3, b3):
    """One-time parameter prep (hoisted out of the per-call path):
    bf16 weights for the MXU, f32 biases, w3/b3 zero-padded to a lane-dense 128 columns."""
    out_dim = w3.shape[1]
    w3p = jnp.pad(w3, ((0, 0), (0, OUT_PAD - out_dim)))
    b3p = jnp.pad(b3, ((0, 0), (0, OUT_PAD - out_dim)))
    return (w1.astype(jnp.bfloat16), b1.astype(jnp.float32),
            w2.astype(jnp.bfloat16), b2.astype(jnp.float32),
            w3p.astype(jnp.bfloat16), b3p.astype(jnp.float32))


def choose_block_b(B, max_tile=512):
    """Two balanced 16-row-aligned tiles when possible (both v7x TCs busy; the extra grid
    step on single-TC v5e/v6e is ~0.35 us), else a capped tile that keeps the double-buffered
    footprint well under the 16 MiB v5e scoped-VMEM default."""
    Br = _round_up(max(B, 16), 16)
    if Br <= 2 * max_tile:
        return max(16, _round_up(pl.cdiv(Br, 2), 16))
    return max_tile


@functools.partial(jax.jit, static_argnames=("out_dim", "block_b"))
def mlp_forward(x, w1, b1, w2, b2, w3, b3, *, out_dim, block_b):
    """Runs the fused MLP on pre-prepared (bf16 / padded) params.
    Returns (B, out_dim) f32, matching the PyTorch eval forward."""
    B, in_dim = x.shape
    hid = w1.shape[1]
    hid2 = w2.shape[1]

    # Cast x to bf16 first (half the bytes), then pad batch only if needed.
    x_bf = x.astype(jnp.bfloat16)
    pad_b = (-B) % block_b
    if pad_b:
        x_bf = jnp.pad(x_bf, ((0, pad_b), (0, 0)))
    Bp = B + pad_b

    grid = (Bp // block_b,)

    flops = 2 * Bp * (in_dim * hid + hid * hid2 + hid2 * OUT_PAD)
    bytes_accessed = (
        Bp * in_dim * 2 + w1.size * 2 + w2.size * 2 + w3.size * 2
        + b1.size * 4 + b2.size * 4 + b3.size * 4 + Bp * OUT_PAD * 4
    )

    out_padded = pl.pallas_call(
        mlp_kernel,
        out_shape=jax.ShapeDtypeStruct((Bp, OUT_PAD), jnp.float32),
        grid_spec=pltpu.PrefetchScalarGridSpec(
            num_scalar_prefetch=0,
            grid=grid,
            in_specs=[
                # x: tiled along batch (block_b multiple of 16, in_dim multiple of 128)
                pl.BlockSpec((block_b, in_dim), lambda i: (i, 0)),
                # weights / biases: full arrays, same block for every grid step
                pl.BlockSpec((in_dim, hid), lambda i: (0, 0)),
                pl.BlockSpec((1, hid), lambda i: (0, 0)),
                pl.BlockSpec((hid, hid2), lambda i: (0, 0)),
                pl.BlockSpec((1, hid2), lambda i: (0, 0)),
                pl.BlockSpec((hid2, OUT_PAD), lambda i: (0, 0)),
                pl.BlockSpec((1, OUT_PAD), lambda i: (0, 0)),
            ],
            out_specs=pl.BlockSpec((block_b, OUT_PAD), lambda i: (i, 0)),
        ),
        compiler_params=pltpu.CompilerParams(
            dimension_semantics=("parallel",),
        ),
        cost_estimate=pl.CostEstimate(
            flops=flops, transcendentals=0, bytes_accessed=bytes_accessed),
    )(x_bf, w1, b1, w2, b2, w3, b3)

    # Strip padding (batch rows + output lanes) outside the kernel.
    return out_padded[:B, :out_dim]


def init_params(key, input_dim, hidden_dim, output_dim):
    """Deterministic synthetic parameters (shapes match nn.Linear layers)."""
    k1, k2, k3, k4, k5, k6 = jax.random.split(key, 6)
    scale1 = 1.0 / jnp.sqrt(input_dim)
    scale2 = 1.0 / jnp.sqrt(hidden_dim)
    scale3 = 1.0 / jnp.sqrt(hidden_dim // 2)
    # Stored as (in_features, out_features); equals PyTorch weight.T
    w1 = jax.random.uniform(k1, (input_dim, hidden_dim), jnp.float32, -scale1, scale1)
    b1 = jax.random.uniform(k2, (1, hidden_dim), jnp.float32, -scale1, scale1)
    w2 = jax.random.uniform(k3, (hidden_dim, hidden_dim // 2), jnp.float32, -scale2, scale2)
    b2 = jax.random.uniform(k4, (1, hidden_dim // 2), jnp.float32, -scale2, scale2)
    w3 = jax.random.uniform(k5, (hidden_dim // 2, output_dim), jnp.float32, -scale3, scale3)
    b3 = jax.random.uniform(k6, (1, output_dim), jnp.float32, -scale3, scale3)
    return w1, b1, w2, b2, w3, b3


def mlp_reference_bf16(x, w1, b1, w2, b2, w3, b3):
    """Reference with the same bf16-input / f32-accumulate numerics as the kernel."""
    bf = jnp.bfloat16
    h1 = jnp.maximum(
        jnp.dot(x.astype(bf), w1.astype(bf), preferred_element_type=jnp.float32) + b1, 0.0)
    h2 = jnp.maximum(
        jnp.dot(h1.astype(bf), w2.astype(bf), preferred_element_type=jnp.float32) + b2, 0.0)
    return jnp.dot(h2.astype(bf), w3.astype(bf), preferred_element_type=jnp.float32) + b3


def mlp_reference_f32(x, w1, b1, w2, b2, w3, b3):
    h1 = jnp.maximum(x @ w1 + b1, 0.0)
    h2 = jnp.maximum(h1 @ w2 + b2, 0.0)
    return h2 @ w3 + b3


if __name__ == "__main__":
    key = jax.random.PRNGKey(0)
    kx, kp = jax.random.split(key)

    B = 256
    x = jax.random.normal(kx, (B, INPUT_DIM), jnp.float32)
    params = init_params(kp, INPUT_DIM, HIDDEN_DIM, OUTPUT_DIM)

    # One-time param prep (bf16 cast + lane padding), materialized before the forward path.
    prepped = prepare_params(*params)
    prepped = jax.block_until_ready(prepped)

    block_b = choose_block_b(B)          # -> 128: two balanced tiles (both v7x TCs)
    out = mlp_forward(x, *prepped, out_dim=OUTPUT_DIM, block_b=block_b)
    out = jax.block_until_ready(out)
    assert out.shape == (B, OUTPUT_DIM), out.shape

    # Numerics-matched reference (same bf16 inputs, f32 accumulation).
    ref_bf = mlp_reference_bf16(x, *params)
    assert jnp.allclose(out, ref_bf, atol=2e-3, rtol=2e-3), "mismatch vs bf16-matched reference"

    # Loose check against the full-f32 PyTorch-equivalent math (bf16 input rounding).
    ref_f32 = mlp_reference_f32(x, *params)
    assert jnp.allclose(out, ref_f32, atol=5e-2, rtol=5e-2), "mismatch vs f32 reference"

    print("KERNEL_OK")
</pallas_src>

<mosaic_0001>
module attributes {stable_mosaic.version = 11 : i64} {
  func.func @mlp_kernel(%arg0: i32, %arg1: memref<128x512xbf16, #tpu.memory_space<vmem>>, %arg2: memref<512x256xbf16, #tpu.memory_space<vmem>>, %arg3: memref<1x256xf32, #tpu.memory_space<vmem>>, %arg4: memref<256x128xbf16, #tpu.memory_space<vmem>>, %arg5: memref<1x128xf32, #tpu.memory_space<vmem>>, %arg6: memref<128x128xbf16, #tpu.memory_space<vmem>>, %arg7: memref<1x128xf32, #tpu.memory_space<vmem>>, %arg8: memref<128x128xf32, #tpu.memory_space<vmem>>) attributes {dimension_semantics = [#tpu.dimension_semantics<parallel>], iteration_bounds = array<i64: 2>, scalar_prefetch = 0 : i64, scratch_operands = 0 : i64, tpu.core_type = #tpu.core_type<tc>, window_params = [{transform_indices = @transform_0, window_bounds = array<i64: 128, 512>}, {pipeline_mode = #tpu.pipeline_mode<synchronous>, transform_indices = @transform_1, window_bounds = array<i64: 512, 256>}, {pipeline_mode = #tpu.pipeline_mode<synchronous>, transform_indices = @transform_2, window_bounds = array<i64: 1, 256>}, {pipeline_mode = #tpu.pipeline_mode<synchronous>, transform_indices = @transform_3, window_bounds = array<i64: 256, 128>}, {pipeline_mode = #tpu.pipeline_mode<synchronous>, transform_indices = @transform_4, window_bounds = array<i64: 1, 128>}, {pipeline_mode = #tpu.pipeline_mode<synchronous>, transform_indices = @transform_5, window_bounds = array<i64: 128, 128>}, {pipeline_mode = #tpu.pipeline_mode<synchronous>, transform_indices = @transform_6, window_bounds = array<i64: 1, 128>}, {transform_indices = @transform_7, window_bounds = array<i64: 128, 128>}]} {
    %c0 = arith.constant 0 : index
    %c0_0 = arith.constant 0 : index
    %0 = vector.load %arg2[%c0, %c0_0] : memref<512x256xbf16, #tpu.memory_space<vmem>>, vector<512x256xbf16>
    %c0_1 = arith.constant 0 : index
    %c0_2 = arith.constant 0 : index
    %1 = vector.load %arg3[%c0_1, %c0_2] : memref<1x256xf32, #tpu.memory_space<vmem>>, vector<1x256xf32>
    %c0_3 = arith.constant 0 : index
    %c0_4 = arith.constant 0 : index
    %2 = vector.load %arg4[%c0_3, %c0_4] : memref<256x128xbf16, #tpu.memory_space<vmem>>, vector<256x128xbf16>
    %c0_5 = arith.constant 0 : index
    %c0_6 = arith.constant 0 : index
    %3 = vector.load %arg5[%c0_5, %c0_6] : memref<1x128xf32, #tpu.memory_space<vmem>>, vector<1x128xf32>
    %c0_7 = arith.constant 0 : index
    %c0_8 = arith.constant 0 : index
    %4 = vector.load %arg6[%c0_7, %c0_8] : memref<128x128xbf16, #tpu.memory_space<vmem>>, vector<128x128xbf16>
    %c0_9 = arith.constant 0 : index
    %c0_10 = arith.constant 0 : index
    %5 = vector.load %arg7[%c0_9, %c0_10] : memref<1x128xf32, #tpu.memory_space<vmem>>, vector<1x128xf32>
    %c0_11 = arith.constant 0 : index
    %c0_12 = arith.constant 0 : index
    %6 = vector.load %arg1[%c0_11, %c0_12] : memref<128x512xbf16, #tpu.memory_space<vmem>>, vector<64x512xbf16>
    %cst = arith.constant dense<0.000000e+00> : vector<64x256xf32>
    %7 = tpu.matmul %6, %0, %cst {dimension_numbers = #tpu.dot_dimension_numbers<[1], [0], [0], [1], [0, 0, 1, 1], [], []>} : vector<64x512xbf16>, vector<512x256xbf16>, vector<64x256xf32> -> vector<64x256xf32>
    %8 = vector.broadcast %1 : vector<1x256xf32> to vector<64x256xf32>
    %9 = arith.addf %7, %8 : vector<64x256xf32>
    %cst_13 = arith.constant 0.000000e+00 : f32
    %10 = vector.broadcast %cst_13 : f32 to vector<64x256xf32>
    %11 = arith.maximumf %9, %10 : vector<64x256xf32>
    %12 = arith.truncf %11 : vector<64x256xf32> to vector<64x256xbf16>
    %cst_14 = arith.constant dense<0.000000e+00> : vector<64x128xf32>
    %13 = tpu.matmul %12, %2, %cst_14 {dimension_numbers = #tpu.dot_dimension_numbers<[1], [0], [0], [1], [0, 0, 1, 1], [], []>} : vector<64x256xbf16>, vector<256x128xbf16>, vector<64x128xf32> -> vector<64x128xf32>
    %14 = vector.broadcast %3 : vector<1x128xf32> to vector<64x128xf32>
    %15 = arith.addf %13, %14 : vector<64x128xf32>
    %cst_15 = arith.constant 0.000000e+00 : f32
    %16 = vector.broadcast %cst_15 : f32 to vector<64x128xf32>
    %17 = arith.maximumf %15, %16 : vector<64x128xf32>
    %18 = arith.truncf %17 : vector<64x128xf32> to vector<64x128xbf16>
    %cst_16 = arith.constant dense<0.000000e+00> : vector<64x128xf32>
    %19 = tpu.matmul %18, %4, %cst_16 {dimension_numbers = #tpu.dot_dimension_numbers<[1], [0], [0], [1], [0, 0, 1, 1], [], []>} : vector<64x128xbf16>, vector<128x128xbf16>, vector<64x128xf32> -> vector<64x128xf32>
    %20 = vector.broadcast %5 : vector<1x128xf32> to vector<64x128xf32>
    %21 = arith.addf %19, %20 : vector<64x128xf32>
    %c0_17 = arith.constant 0 : index
    %c0_18 = arith.constant 0 : index
    %22 = vector.load %arg8[%c0_17, %c0_18] : memref<128x128xf32, #tpu.memory_space<vmem>>, vector<64x128xf32>
    tpu.vector_store %arg8[%c0_17, %c0_18], %21 {strides = array<i32>} : memref<128x128xf32, #tpu.memory_space<vmem>>, vector<64x128xf32>,
    %c64 = arith.constant 64 : index
    %c0_19 = arith.constant 0 : index
    %23 = vector.load %arg1[%c64, %c0_19] : memref<128x512xbf16, #tpu.memory_space<vmem>>, vector<64x512xbf16>
    %cst_20 = arith.constant dense<0.000000e+00> : vector<64x256xf32>
    %24 = tpu.matmul %23, %0, %cst_20 {dimension_numbers = #tpu.dot_dimension_numbers<[1], [0], [0], [1], [0, 0, 1, 1], [], []>} : vector<64x512xbf16>, vector<512x256xbf16>, vector<64x256xf32> -> vector<64x256xf32>
    %25 = vector.broadcast %1 : vector<1x256xf32> to vector<64x256xf32>
    %26 = arith.addf %24, %25 : vector<64x256xf32>
    %cst_21 = arith.constant 0.000000e+00 : f32
    %27 = vector.broadcast %cst_21 : f32 to vector<64x256xf32>
    %28 = arith.maximumf %26, %27 : vector<64x256xf32>
    %29 = arith.truncf %28 : vector<64x256xf32> to vector<64x256xbf16>
    %cst_22 = arith.constant dense<0.000000e+00> : vector<64x128xf32>
    %30 = tpu.matmul %29, %2, %cst_22 {dimension_numbers = #tpu.dot_dimension_numbers<[1], [0], [0], [1], [0, 0, 1, 1], [], []>} : vector<64x256xbf16>, vector<256x128xbf16>, vector<64x128xf32> -> vector<64x128xf32>
    %31 = vector.broadcast %3 : vector<1x128xf32> to vector<64x128xf32>
    %32 = arith.addf %30, %31 : vector<64x128xf32>
    %cst_23 = arith.constant 0.000000e+00 : f32
    %33 = vector.broadcast %cst_23 : f32 to vector<64x128xf32>
    %34 = arith.maximumf %32, %33 : vector<64x128xf32>
    %35 = arith.truncf %34 : vector<64x128xf32> to vector<64x128xbf16>
    %cst_24 = arith.constant dense<0.000000e+00> : vector<64x128xf32>
    %36 = tpu.matmul %35, %4, %cst_24 {dimension_numbers = #tpu.dot_dimension_numbers<[1], [0], [0], [1], [0, 0, 1, 1], [], []>} : vector<64x128xbf16>, vector<128x128xbf16>, vector<64x128xf32> -> vector<64x128xf32>
    %37 = vector.broadcast %5 : vector<1x128xf32> to vector<64x128xf32>
    %38 = arith.addf %36, %37 : vector<64x128xf32>
    %c64_25 = arith.constant 64 : index
    %c0_26 = arith.constant 0 : index
    %39 = vector.load %arg8[%c64_25, %c0_26] : memref<128x128xf32, #tpu.memory_space<vmem>>, vector<64x128xf32>
    tpu.vector_store %arg8[%c64_25, %c0_26], %38 {strides = array<i32>} : memref<128x128xf32, #tpu.memory_space<vmem>>, vector<64x128xf32>,
    return
  }
  func.func @transform_0(%arg0: i32) -> (i32, i32) {
    %c0_i32 = arith.constant 0 : i32
    %c0_i32_0 = arith.constant 0 : i32
    return %arg0, %c0_i32 : i32, i32
  }
  func.func @transform_1(%arg0: i32) -> (i32, i32) {
    %c0_i32 = arith.constant 0 : i32
    %c0_i32_0 = arith.constant 0 : i32
    %c0_i32_1 = arith.constant 0 : i32
    return %c0_i32, %c0_i32_0 : i32, i32
  }
  func.func @transform_2(%arg0: i32) -> (i32, i32) {
    %c0_i32 = arith.constant 0 : i32
    %c0_i32_0 = arith.constant 0 : i32
    %c0_i32_1 = arith.constant 0 : i32
    return %c0_i32, %c0_i32_0 : i32, i32
  }
  func.func @transform_3(%arg0: i32) -> (i32, i32) {
    %c0_i32 = arith.constant 0 : i32
    %c0_i32_0 = arith.constant 0 : i32
    %c0_i32_1 = arith.constant 0 : i32
    return %c0_i32, %c0_i32_0 : i32, i32
  }
  func.func @transform_4(%arg0: i32) -> (i32, i32) {
    %c0_i32 = arith.constant 0 : i32
    %c0_i32_0 = arith.constant 0 : i32
    %c0_i32_1 = arith.constant 0 : i32
    return %c0_i32, %c0_i32_0 : i32, i32
  }
  func.func @transform_5(%arg0: i32) -> (i32, i32) {
    %c0_i32 = arith.constant 0 : i32
    %c0_i32_0 = arith.constant 0 : i32
    %c0_i32_1 = arith.constant 0 : i32
    return %c0_i32, %c0_i32_0 : i32, i32
  }
  func.func @transform_6(%arg0: i32) -> (i32, i32) {
    %c0_i32 = arith.constant 0 : i32
    %c0_i32_0 = arith.constant 0 : i32
    %c0_i32_1 = arith.constant 0 : i32
    return %c0_i32, %c0_i32_0 : i32, i32
  }
  func.func @transform_7(%arg0: i32) -> (i32, i32) {
    %c0_i32 = arith.constant 0 : i32
    %c0_i32_0 = arith.constant 0 : i32
    return %arg0, %c0_i32 : i32, i32
  }
}

</mosaic_0001>

<bundles_post_ra>
// kernel: mlp_forward.1
= control target key start
LH: loop header
LB: loop body
LE: loop exit
PB: predicated region body
PF: predicated region fallthrough
CT: control target
= control target key end

     0   :  { %s2536_s24 = smov 0   ;;  %s3642_s0 = inlined_call_operand.vmem [shape: bf16[256,512], index: 0, kind: input, shape index: {}]   ;;  %s3643_s1 = inlined_call_operand.vmem [shape: bf16[512,256], index: 1, kind: input, shape index: {}]   ;;  %s3644_s2 = inlined_call_operand.vmem [shape: f32[1,256], index: 2, kind: input, shape index: {}]   ;;  %s3645_s3 = inlined_call_operand.vmem [shape: bf16[256,128], index: 3, kind: input, shape index: {}]   ;;  %s3646_s4 = inlined_call_operand.vmem [shape: f32[1,128], index: 4, kind: input, shape index: {}]   ;;  %s3647_s5 = inlined_call_operand.vmem [shape: bf16[128,128], index: 5, kind: input, shape index: {}]   ;;  %s3648_s6 = inlined_call_operand.vmem [shape: f32[1,128], index: 6, kind: input, shape index: {}]   ;;  %s3649_s7 = inlined_call_operand.vmem [shape: f32[256,128], index: 7, kind: output, shape index: {}]  }
   0x1 LB: > { %s1849_s25 = sadd.s32 4294967295, %s2494_s24   ;;  %p1853_p0 = scmp.ge.s32.totalorder %s2494_s24, 1  ;;  %s2494_s24 = sphi %s2536_s24, %s17_s24  }
   0x2   : > { %p239_p1 = scmp.lt.s32.totalorder %s2494_s24, 3 }
   0x4   : > { %p240_p2 = pnand %p1853_p0, %p239_p1 }
   0x6   : > { %243 = sbr.rel (%p240_p2) target bundleno = 1029 (0x405), region = 48 }
   0xb   : > { %v1981_v0 = vld [vmem:[%s3643_s1 + $0x70] sm:$0xf]  ;;  %v2357_v1 = vld [vmem:[%s3643_s1 + $0x74] sm:$0xf0]  ;;  %v1973_v5 = vld [vmem:[%s3643_s1 + $0x60] sm:$0xf] }
   0xc   : > { %v2045_v2 = vld [vmem:[%s3643_s1 + $0xf0] sm:$0xf]  ;;  %v2553_v3 = vor.u32 %v2357_v1, %v1981_v0  ;;  %v2373_v4 = vld [vmem:[%s3643_s1 + $0xf4] sm:$0xf0]  ;;  %v2355_v6 = vld [vmem:[%s3643_s1 + $0x64] sm:$0xf0] }
   0xd   : > { %v2564_v7 = vor.u32 %v2373_v4, %v2045_v2  ;;  %v2037_v8 = vld [vmem:[%s3643_s1 + $0xe0] sm:$0xf]  ;;  %v2371_v9 = vld [vmem:[%s3643_s1 + $0xe4] sm:$0xf0]  ;;  %v2573_v10 = vor.u32 %v2355_v6, %v1973_v5  ;;  %v1965_v12 = vld [vmem:[%s3643_s1 + $0x50] sm:$0xf] }
   0xe   : > { %2462 = vmatpush.bf16.msra.mxu2 %v2553_v3  ;;  %821 = vmatpush.bf16.msra.mxu0 %v2553_v3  ;;  %v2577_v11 = vor.u32 %v2371_v9, %v2037_v8  ;;  %v2353_v13 = vld [vmem:[%s3643_s1 + $0x54] sm:$0xf0]  ;;  %v2029_v14 = vld [vmem:[%s3643_s1 + $0xd0] sm:$0xf]  ;;  %v1957_v18 = vld [vmem:[%s3643_s1 + $0x40] sm:$0xf] }
   0xf   : > { %2470 = vmatpush.bf16.msra.mxu3 %v2564_v7  ;;  %850 = vmatpush.bf16.msra.mxu1 %v2564_v7  ;;  %v2369_v15 = vld [vmem:[%s3643_s1 + $0xd4] sm:$0xf0]  ;;  %v2593_v16 = vor.u32 %v2353_v13, %v1965_v12  ;;  %v2351_v19 = vld [vmem:[%s3643_s1 + $0x44] sm:$0xf0]  ;;  %v2021_v20 = vld [vmem:[%s3643_s1 + $0xc0] sm:$0xf] }
  0x10   : > { %v2597_v17 = vor.u32 %v2369_v15, %v2029_v14  ;;  %v2367_v21 = vld [vmem:[%s3643_s1 + $0xc4] sm:$0xf0]  ;;  %s1854_s14 = sshll.u32 %s1849_s25, 4  ;;  %v2615_v22 = vor.u32 %v2351_v19, %v1957_v18  ;;  %v1949_v24 = vld [vmem:[%s3643_s1 + $0x30] sm:$0xf] }
  0x11   : > { %v2619_v23 = vor.u32 %v2367_v21, %v2021_v20  ;;  %v2349_v25 = vld [vmem:[%s3643_s1 + $0x34] sm:$0xf0]  ;;  %v2013_v26 = vld [vmem:[%s3643_s1 + $0xb0] sm:$0xf]  ;;  %p273_p3 = scmp.lt.s32.totalorder %s1854_s14, 31 }
  0x12   : > { %2463 = vmatpush.bf16.msra.mxu2 %v2573_v10  ;;  %822 = vmatpush.bf16.msra.mxu0 %v2573_v10  ;;  %v2365_v27 = vld [vmem:[%s3643_s1 + $0xb4] sm:$0xf0]  ;;  %v2635_v28 = vor.u32 %v2349_v25, %v1949_v24  ;;  %v1941_v30 = vld [vmem:[%s3643_s1 + $0x20] sm:$0xf]  ;;  %v2347_v31 = vld [vmem:[%s3643_s1 + $0x24] sm:$0xf0] }
  0x13   : > { %2471 = vmatpush.bf16.msra.mxu3 %v2577_v11  ;;  %851 = vmatpush.bf16.msra.mxu1 %v2577_v11  ;;  %v2639_v29 = vor.u32 %v2365_v27, %v2013_v26  ;;  %v2005_v32 = vld [vmem:[%s3643_s1 + $0xa0] sm:$0xf]  ;;  %v2363_v33 = vld [vmem:[%s3643_s1 + $0xa4] sm:$0xf0]  ;;  %s3717_s14 = smov (!%p273_p3, %s1854_s14), 31  ;;  %v2657_v34 = vor.u32 %v2347_v31, %v1941_v30 }
  0x14   : > { %v2661_v35 = vor.u32 %v2363_v33, %v2005_v32  ;;  %v1933_v36 = vld [vmem:[%s3643_s1 + $0x10] sm:$0xf]  ;;  %v2345_v37 = vld [vmem:[%s3643_s1 + $0x14] sm:$0xf0]  ;;  %s2341_s18 = sshll.u32 %s3717_s14, 4  ;;  %s1858_s12 = sshll.u32 %s3717_s14, 3 }
  0x15   : > { %v1997_v38 = vld [vmem:[%s3643_s1 + $0x90] sm:$0xf]  ;;  %v2361_v39 = vld [vmem:[%s3643_s1 + $0x94] sm:$0xf0]  ;;  %v2678_v40 = vor.u32 %v2345_v37, %v1933_v36  ;;  %v1925_v42 = vld [vmem:[%s3643_s1] sm:$0xf]  ;;  %s2696_s28 = scalar_lea.vmem %s3642_s0, %s2341_s18  ;;  %s3581_s18 = scalar_lea.vmem %s3649_s7, %s1858_s12 }
  0x16   : > { %2464 = vmatpush.bf16.msra.mxu2 %v2593_v16  ;;  %823 = vmatpush.bf16.msra.mxu0 %v2593_v16  ;;  %v2682_v41 = vor.u32 %v2361_v39, %v1997_v38  ;;  %v2343_v43 = vld [vmem:[%s3643_s1 + $0x4] sm:$0xf0]  ;;  %v1989_v44 = vld [vmem:[%s3643_s1 + $0x80] sm:$0xf]  ;;  %v2109_v46 = vld [vmem:[%s3643_s1 + $0x170] sm:$0xf] }
  0x17   : > { %2472 = vmatpush.bf16.msra.mxu3 %v2597_v17  ;;  %852 = vmatpush.bf16.msra.mxu1 %v2597_v17  ;;  %v2359_v45 = vld [vmem:[%s3643_s1 + $0x84] sm:$0xf0]  ;;  %v2389_v47 = vld [vmem:[%s3643_s1 + $0x174] sm:$0xf0]  ;;  %v2173_v48 = vld [vmem:[%s3643_s1 + $0x1f0] sm:$0xf]  ;;  %v2715_v50 = vor.u32 %v2343_v43, %v1925_v42 }
  0x18   : > { %v2405_v49 = vld [vmem:[%s3643_s1 + $0x1f4] sm:$0xf0]  ;;  %v1893_v51 = vld [vmem:[%s2696_s28 + $0x40] sm:$0xf]  ;;  %v2440_v52 = vld [vmem:[%s2696_s28 + $0x4c] sm:$0xf0]  ;;  %v2721_v53 = vor.u32 %v2359_v45, %v1989_v44  ;;  %v2725_v56 = vor.u32 %v2389_v47, %v2109_v46 }
  0x19   : > { %v2438_v54 = vld [vmem:[%s2696_s28 + $0x44] sm:$0xf]  ;;  %v1895_v55 = vld [vmem:[%s2696_s28 + $0x50] sm:$0xf0]  ;;  %v2728_v57 = vor.u32 %v2405_v49, %v2173_v48  ;;  %v2101_v58 = vld [vmem:[%s3643_s1 + $0x160] sm:$0xf]  ;;  %v2736_v60 = vor.u32 %v2440_v52, %v1893_v51 }
  0x1a   : > { %2465 = vmatpush.bf16.msra.mxu2 %v2615_v22  ;;  %824 = vmatpush.bf16.msra.mxu0 %v2615_v22  ;;  %v2387_v59 = vld [vmem:[%s3643_s1 + $0x164] sm:$0xf0]  ;;  %v2165_v61 = vld [vmem:[%s3643_s1 + $0x1e0] sm:$0xf]  ;;  %v2745_v63 = vor.u32 %v2438_v54, %v1895_v55  ;;  %v2093_v2 = vld [vmem:[%s3643_s1 + $0x150] sm:$0xf] }
  0x1b   : > { %2473 = vmatpush.bf16.msra.mxu3 %v2619_v23  ;;  %853 = vmatpush.bf16.msra.mxu1 %v2619_v23  ;;  %3672 = vst [vmem:[#allocation2_spill] sm:$0xff] %v2728_v57  ;;  %v2403_v62 = vld [vmem:[%s3643_s1 + $0x1e4] sm:$0xf0]  ;;  %v2750_v0 = vor.u32 %v2387_v59, %v2101_v58  ;;  %v2385_v4 = vld [vmem:[%s3643_s1 + $0x154] sm:$0xf0] }
  0x1c   : > { %v2753_v1 = vor.u32 %v2403_v62, %v2165_v61  ;;  %v2157_v5 = vld [vmem:[%s3643_s1 + $0x1d0] sm:$0xf]  ;;  %v2401_v6 = vld [vmem:[%s3643_s1 + $0x1d4] sm:$0xf0]  ;;  %v1861_v8 = vld [vmem:[%s2696_s28] sm:$0xf]  ;;  %v2775_v13 = vor.u32 %v2385_v4, %v2093_v2 }
  0x1d   : > { %v2432_v9 = vld [vmem:[%s2696_s28 + $0xc] sm:$0xf0]  ;;  %v2430_v14 = vld [vmem:[%s2696_s28 + $0x4] sm:$0xf]  ;;  %v1863_v15 = vld [vmem:[%s2696_s28 + $0x10] sm:$0xf0]  ;;  %v2780_v18 = vor.u32 %v2401_v6, %v2157_v5 }
  0x1e   : > { %2466 = vmatpush.bf16.msra.mxu2 %v2635_v28  ;;  %825 = vmatpush.bf16.msra.mxu0 %v2635_v28  ;;  %3673 = vst [vmem:[#allocation3_spill] sm:$0xff] %v2753_v1  ;;  %v2772_v12 = vor.u32 %v2432_v9, %v1861_v8  ;;  %v2085_v19 = vld [vmem:[%s3643_s1 + $0x140] sm:$0xf]  ;;  %v2383_v20 = vld [vmem:[%s3643_s1 + $0x144] sm:$0xf0]  ;;  %v2789_v21 = vor.u32 %v2430_v14, %v1863_v15 }
  0x1f   : > { %2474 = vmatpush.bf16.msra.mxu3 %v2639_v29  ;;  %854 = vmatpush.bf16.msra.mxu1 %v2639_v29  ;;  %3674 = vst [vmem:[#allocation4_spill] sm:$0xff] %v2780_v18  ;;  %v2149_v24 = vld [vmem:[%s3643_s1 + $0x1c0] sm:$0xf]  ;;  %v2399_v25 = vld [vmem:[%s3643_s1 + $0x1c4] sm:$0xf0]  ;;  %v2799_v26 = vor.u32 %v2383_v20, %v2085_v19 }
  0x20   : > { %v2802_v27 = vor.u32 %v2399_v25, %v2149_v24  ;;  %v2077_v30 = vld [vmem:[%s3643_s1 + $0x130] sm:$0xf]  ;;  %v2381_v31 = vld [vmem:[%s3643_s1 + $0x134] sm:$0xf0]  ;;  %v1909_v36 = vld [vmem:[%s2696_s28 + $0x60] sm:$0xf] }
  0x21   : > { %v2141_v32 = vld [vmem:[%s3643_s1 + $0x1b0] sm:$0xf]  ;;  %v2397_v33 = vld [vmem:[%s3643_s1 + $0x1b4] sm:$0xf0]  ;;  %v2442_v38 = vld [vmem:[%s2696_s28 + $0x64] sm:$0xf]  ;;  %v2821_v42 = vor.u32 %v2381_v31, %v2077_v30 }
  0x22   : > { %2467 = vmatpush.bf16.msra.mxu2 %v2657_v34  ;;  %826 = vmatpush.bf16.msra.mxu0 %v2657_v34  ;;  %3675 = vst [vmem:[#allocation5_spill] sm:$0xff] %v2802_v27  ;;  %v2444_v37 = vld [vmem:[%s2696_s28 + $0x6c] sm:$0xf0]  ;;  %v1911_v39 = vld [vmem:[%s2696_s28 + $0x70] sm:$0xf0]  ;;  %v2824_v43 = vor.u32 %v2397_v33, %v2141_v32 }
  0x23   : > { %2475 = vmatpush.bf16.msra.mxu3 %v2661_v35  ;;  %855 = vmatpush.bf16.msra.mxu1 %v2661_v35  ;;  %v2069_v44 = vld [vmem:[%s3643_s1 + $0x120] sm:$0xf]  ;;  %v2379_v45 = vld [vmem:[%s3643_s1 + $0x124] sm:$0xf0]  ;;  %v2832_v46 = vor.u32 %v2444_v37, %v1909_v36  ;;  %v2840_v49 = vor.u32 %v2442_v38, %v1911_v39  ;;  %v2061_v54 = vld [vmem:[%s3643_s1 + $0x110] sm:$0xf] }
  0x24   : > { %3676 = vst [vmem:[#allocation6_spill] sm:$0xff] %v2824_v43  ;;  %v2133_v47 = vld [vmem:[%s3643_s1 + $0x1a0] sm:$0xf]  ;;  %v2395_v48 = vld [vmem:[%s3643_s1 + $0x1a4] sm:$0xf0]  ;;  %v2843_v51 = vor.u32 %v2379_v45, %v2069_v44 }
  0x25   : > { %v2846_v52 = vor.u32 %v2395_v48, %v2133_v47  ;;  %v2377_v55 = vld [vmem:[%s3643_s1 + $0x114] sm:$0xf0]  ;;  %v2125_v58 = vld [vmem:[%s3643_s1 + $0x190] sm:$0xf]  ;;  %v1877_v61 = vld [vmem:[%s2696_s28 + $0x20] sm:$0xf] }
  0x26   : > { %2468 = vmatpush.bf16.msra.mxu2 %v2678_v40  ;;  %827 = vmatpush.bf16.msra.mxu0 %v2678_v40  ;;  %v2393_v59 = vld [vmem:[%s3643_s1 + $0x194] sm:$0xf0]  ;;  %v2436_v62 = vld [vmem:[%s2696_s28 + $0x2c] sm:$0xf0]  ;;  %v2053_v2 = vld [vmem:[%s3643_s1 + $0x100] sm:$0xf]  ;;  %v2873_v6 = vor.u32 %v2377_v55, %v2061_v54 }
  0x27   : > { %2476 = vmatpush.bf16.msra.mxu3 %v2682_v41  ;;  %856 = vmatpush.bf16.msra.mxu1 %v2682_v41  ;;  %3677 = vst [vmem:[#allocation7_spill] sm:$0xff] %v2846_v52  ;;  %v2375_v4 = vld [vmem:[%s3643_s1 + $0x104] sm:$0xf0]  ;;  %v2870_v5 = vor.u32 %v2436_v62, %v1877_v61  ;;  %v2117_v8 = vld [vmem:[%s3643_s1 + $0x180] sm:$0xf]  ;;  %v2884_v19 = vor.u32 %v2393_v59, %v2125_v58 }
  0x28   : > { %v2391_v9 = vld [vmem:[%s3643_s1 + $0x184] sm:$0xf0]  ;;  %v2434_v14 = vld [vmem:[%s2696_s28 + $0x24] sm:$0xf]  ;;  %v1879_v15 = vld [vmem:[%s2696_s28 + $0x30] sm:$0xf0]  ;;  %v2920_v44 = vor.u32 %v2375_v4, %v2053_v2 }
  0x29   : > { %3678 = vst [vmem:[#allocation8_spill] sm:$0xff] %v2884_v19  ;;  %v2388_v20 = vld [vmem:[%s3643_s1 + $0x174] sm:$0xf]  ;;  %v2111_v24 = vld [vmem:[%s3643_s1 + $0x178] sm:$0xf0]  ;;  %v2896_v30 = vor.u32 %v2434_v14, %v1879_v15  ;;  %v2928_v48 = vor.u32 %v2391_v9, %v2117_v8 }
  0x2a   : > { %2469 = vmatpush.bf16.msra.mxu2 %v2715_v50  ;;  %828 = vmatpush.bf16.msra.mxu0 %v2715_v50  ;;  %v2404_v25 = vld [vmem:[%s3643_s1 + $0x1f4] sm:$0xf]  ;;  %v2175_v31 = vld [vmem:[%s3643_s1 + $0x1f8] sm:$0xf0]  ;;  %v2354_v39 = vld [vmem:[%s3643_s1 + $0x64] sm:$0xf]  ;;  %v2930_v54 = vor.u32 %v2388_v20, %v2111_v24 }
  0x2b   : > { %2477 = vmatpush.bf16.msra.mxu3 %v2721_v53  ;;  %857 = vmatpush.bf16.msra.mxu1 %v2721_v53  ;;  %v2356_v32 = vld [vmem:[%s3643_s1 + $0x74] sm:$0xf]  ;;  %v1983_v33 = vld [vmem:[%s3643_s1 + $0x78] sm:$0xf0]  ;;  %v1975_v47 = vld [vmem:[%s3643_s1 + $0x68] sm:$0xf0]  ;;  %v2934_v58 = vor.u32 %v2404_v25, %v2175_v31 }
  0x2c   : > { %v2908_v36 = vor.u32 %v2356_v32, %v1983_v33  ;;  %v2372_v37 = vld [vmem:[%s3643_s1 + $0xf4] sm:$0xf]  ;;  %v2047_v38 = vld [vmem:[%s3643_s1 + $0xf8] sm:$0xf0]  ;;  %3679 = vst [vmem:[#allocation9_spill] sm:$0xff] %v2928_v48  ;;  %v2943_v62 = vor.u32 %v2354_v39, %v1975_v47 }
  0x2d   : > { %839 = vmatmul.bf16.vlgmr.msra.gmra.mxu2 %v2736_v60  ;;  %829 = vmatmul.bf16.vlgmr.msra.gmra.mxu0 %v2772_v12  ;;  %v2922_v45 = vor.u32 %v2372_v37, %v2047_v38  ;;  %v1869_v55 = vld [vmem:[%s2696_s28 + $0x8] sm:$0xf]  ;;  %3680 = vst [vmem:[#allocation10_spill] sm:$0xff] %v2934_v58  ;;  %v2386_v59 = vld [vmem:[%s3643_s1 + $0x164] sm:$0xf] }
  0x2e   : > { %879 = vmatpush.bf16.msrb.mxu2 %v2725_v56  ;;  %868 = vmatmul.bf16.vlgmr.msra.gmra.mxu3 %v2745_v63  ;;  %v2103_v61 = vld [vmem:[%s3643_s1 + $0x168] sm:$0xf0]  ;;  %v2433_v2 = vld [vmem:[%s2696_s28 + $0x14] sm:$0xf0]  ;;  %v2402_v4 = vld [vmem:[%s3643_s1 + $0x1e4] sm:$0xf] }
  0x2f   : > { %908 = vmatpush.bf16.msrb.mxu3 %v2728_v57  ;;  %858 = vmatmul.bf16.vlgmr.msra.gmra.mxu1 %v2789_v21  ;;  %v2167_v8 = vld [vmem:[%s3643_s1 + $0x1e8] sm:$0xf0]  ;;  %v1871_v14 = vld [vmem:[%s2696_s28 + $0x18] sm:$0xf0]  ;;  %v2957_v15 = vor.u32 %v2386_v59, %v2103_v61  ;;  %v2959_v20 = vor.u32 %v2433_v2, %v1869_v55  ;;  %v2384_v25 = vld [vmem:[%s3643_s1 + $0x154] sm:$0xf] }
  0x30   : > { %937 = vmatpush.bf16.msrb.mxu0 %v2908_v36  ;;  %966 = vmatpush.bf16.msrb.mxu1 %v2922_v45  ;;  %v2431_v9 = vld [vmem:[%s2696_s28 + $0xc] sm:$0xf]  ;;  %v2962_v24 = vor.u32 %v2402_v4, %v2167_v8  ;;  %v2095_v31 = vld [vmem:[%s3643_s1 + $0x158] sm:$0xf0]  ;;  %v2400_v33 = vld [vmem:[%s3643_s1 + $0x1d4] sm:$0xf] }
  0x31   : > { %v2971_v32 = vor.u32 %v2431_v9, %v1871_v14  ;;  %v2159_v37 = vld [vmem:[%s3643_s1 + $0x1d8] sm:$0xf0]  ;;  %v2980_v38 = vor.u32 %v2384_v25, %v2095_v31  ;;  %v2370_v39 = vld [vmem:[%s3643_s1 + $0xe4] sm:$0xf]  ;;  %v2039_v47 = vld [vmem:[%s3643_s1 + $0xe8] sm:$0xf0] }
  0x32   : > { %880 = vmatpush.bf16.msrb.mxu2 %v2750_v0  ;;  %3681 = vst [vmem:[#allocation11_spill] sm:$0xff] %v2962_v24  ;;  %v2990_v55 = vor.u32 %v2400_v33, %v2159_v37  ;;  %v2382_v59 = vld [vmem:[%s3643_s1 + $0x144] sm:$0xf]  ;;  %v2087_v61 = vld [vmem:[%s3643_s1 + $0x148] sm:$0xf0]  ;;  %v2998_v2 = vor.u32 %v2370_v39, %v2039_v47 }
  0x33   : > { %909 = vmatpush.bf16.msrb.mxu3 %v2753_v1  ;;  %3682 = vst [vmem:[#allocation12_spill] sm:$0xff] %v2980_v38  ;;  %v2398_v4 = vld [vmem:[%s3643_s1 + $0x1c4] sm:$0xf]  ;;  %v2151_v8 = vld [vmem:[%s3643_s1 + $0x1c8] sm:$0xf0]  ;;  %v3018_v31 = vor.u32 %v2382_v59, %v2087_v61 }
  0x34   : > { %938 = vmatpush.bf16.msrb.mxu0 %v2943_v62  ;;  %3683 = vst [vmem:[#allocation13_spill] sm:$0xff] %v2990_v55  ;;  %v2380_v9 = vld [vmem:[%s3643_s1 + $0x134] sm:$0xf]  ;;  %967 = vmatpush.bf16.msrb.mxu1 %v2998_v2  ;;  %v1967_v25 = vld [vmem:[%s3643_s1 + $0x58] sm:$0xf0] }
  0x35   : > { %v2352_v14 = vld [vmem:[%s3643_s1 + $0x54] sm:$0xf]  ;;  %3684 = vst [vmem:[#allocation14_spill] sm:$0xff] %v3018_v31  ;;  %v2031_v39 = vld [vmem:[%s3643_s1 + $0xd8] sm:$0xf0] }
  0x36   : > { %881 = vmatpush.bf16.msrb.mxu2 %v2775_v13  ;;  %v3020_v33 = vor.u32 %v2352_v14, %v1967_v25  ;;  %v2368_v37 = vld [vmem:[%s3643_s1 + $0xd4] sm:$0xf]  ;;  %v2350_v47 = vld [vmem:[%s3643_s1 + $0x44] sm:$0xf]  ;;  %v2079_v59 = vld [vmem:[%s3643_s1 + $0x138] sm:$0xf0] }
  0x37   : > { %910 = vmatpush.bf16.msrb.mxu3 %v2780_v18  ;;  %v2396_v61 = vld [vmem:[%s3643_s1 + $0x1b4] sm:$0xf]  ;;  %v3040_v14 = vor.u32 %v2368_v37, %v2031_v39  ;;  %v1959_v25 = vld [vmem:[%s3643_s1 + $0x48] sm:$0xf0]  ;;  %v2346_v1 = vld [vmem:[%s3643_s1 + $0x24] sm:$0xf] }
  0x38   : > { %939 = vmatpush.bf16.msrb.mxu0 %v3020_v33  ;;  %v2023_v37 = vld [vmem:[%s3643_s1 + $0xc8] sm:$0xf0] }
  0x39   : > { %968 = vmatpush.bf16.msrb.mxu1 %v3040_v14  ;;  %v1943_v57 = vld [vmem:[%s3643_s1 + $0x28] sm:$0xf0] }
  0x3a   : > { %882 = vmatpush.bf16.msrb.mxu2 %v2799_v26 }
  0x3b   : > { %911 = vmatpush.bf16.msrb.mxu3 %v2802_v27  ;;  %v2394_v27 = vld [vmem:[%s3643_s1 + $0x1a4] sm:$0xf] }
  0x3d   : > { %844 = vmatmul.bf16.gmra.mxu2 %v2832_v46  ;;  %834 = vmatmul.bf16.gmra.mxu0 %v2870_v5 }
  0x3e   : > { %883 = vmatpush.bf16.msrb.mxu2 %v2821_v42  ;;  %873 = vmatmul.bf16.gmra.mxu3 %v2840_v49 }
  0x3f   : > { %912 = vmatpush.bf16.msrb.mxu3 %v2824_v43  ;;  %863 = vmatmul.bf16.gmra.mxu1 %v2896_v30  ;;  %v2378_v43 = vld [vmem:[%s3643_s1 + $0x124] sm:$0xf] }
  0x42   : > { %884 = vmatpush.bf16.msrb.mxu2 %v2843_v51 }
  0x43   : > { %913 = vmatpush.bf16.msrb.mxu3 %v2846_v52 }
  0x46   : > { %885 = vmatpush.bf16.msrb.mxu2 %v2873_v6 }
  0x47   : > { %914 = vmatpush.bf16.msrb.mxu3 %v2884_v19  ;;  %v2364_v19 = vld [vmem:[%s3643_s1 + $0xb4] sm:$0xf] }
  0x4a   : > { %886 = vmatpush.bf16.msrb.mxu2 %v2920_v44 }
  0x4b   : > { %915 = vmatpush.bf16.msrb.mxu3 %v2928_v48  ;;  %v3068_v48 = vor.u32 %v2380_v9, %v2079_v59  ;;  %v2071_v9 = vld [vmem:[%s3643_s1 + $0x128] sm:$0xf0] }
  0x4c   : > { %v2435_v59 = vld [vmem:[%s2696_s28 + $0x2c] sm:$0xf] }
  0x4d   : > { %887 = vmatmul.bf16.vlgmr.msrb.gmra.mxu2 %v2959_v20  ;;  %3686 = vst [vmem:[#allocation16_spill] sm:$0xff] %v3068_v48 }
  0x4e   : > { %995 = vmatpush.bf16.msra.mxu2 %v2930_v54  ;;  %916 = vmatmul.bf16.vlgmr.msrb.gmra.mxu3 %v2971_v32 }
  0x4f   : > { %1024 = vmatpush.bf16.msra.mxu3 %v2934_v58  ;;  %v2348_v58 = vld [vmem:[%s3643_s1 + $0x34] sm:$0xf] }
  0x52   : > { %996 = vmatpush.bf16.msra.mxu2 %v2957_v15 }
  0x53   : > { %1025 = vmatpush.bf16.msra.mxu3 %v2962_v24  ;;  %v3032_v24 = vor.u32 %v2398_v4, %v2151_v8  ;;  %v2143_v4 = vld [vmem:[%s3643_s1 + $0x1b8] sm:$0xf0]  ;;  %v3049_v8 = vor.u32 %v2350_v47, %v1959_v25  ;;  %v1885_v25 = vld [vmem:[%s2696_s28 + $0x28] sm:$0xf] }
  0x54   : > { %v1951_v47 = vld [vmem:[%s3643_s1 + $0x38] sm:$0xf0]  ;;  %v3078_v52 = vor.u32 %v2396_v61, %v2143_v4  ;;  %v2135_v61 = vld [vmem:[%s3643_s1 + $0x1a8] sm:$0xf0] }
  0x55   : > { %3685 = vst [vmem:[#allocation15_spill] sm:$0xff] %v3032_v24  ;;  %940 = vmatpush.bf16.msrb.mxu0 %v3049_v8  ;;  %v3094_v4 = vor.u32 %v2348_v58, %v1951_v47  ;;  %v3112_v58 = vor.u32 %v2394_v27, %v2135_v61  ;;  %v3117_v47 = vor.u32 %v2346_v1, %v1943_v57  ;;  %v2376_v57 = vld [vmem:[%s3643_s1 + $0x114] sm:$0xf]  ;;  %v2063_v1 = vld [vmem:[%s3643_s1 + $0x118] sm:$0xf0] }
  0x56   : > { %997 = vmatpush.bf16.msra.mxu2 %v2980_v38  ;;  %3687 = vst [vmem:[#allocation17_spill] sm:$0xff] %v3078_v52 }
  0x57   : > { %1026 = vmatpush.bf16.msra.mxu3 %v2990_v55  ;;  %v2366_v55 = vld [vmem:[%s3643_s1 + $0xc4] sm:$0xf]  ;;  %3689 = vst [vmem:[#allocation19_spill] sm:$0xff] %v3112_v58 }
  0x58   : > { %v3058_v39 = vor.u32 %v2366_v55, %v2023_v37  ;;  %v2015_v55 = vld [vmem:[%s3643_s1 + $0xb8] sm:$0xf0]  ;;  %v2437_v37 = vld [vmem:[%s2696_s28 + $0x34] sm:$0xf0] }
  0x59   : > { %v3098_v18 = vor.u32 %v2364_v19, %v2015_v55  ;;  %v3109_v38 = vor.u32 %v2437_v37, %v1885_v25  ;;  %941 = vmatpush.bf16.msrb.mxu0 %v3094_v4  ;;  %v2007_v25 = vld [vmem:[%s3643_s1 + $0xa8] sm:$0xf0]  ;;  %v3142_v55 = vor.u32 %v2376_v57, %v2063_v1  ;;  %v2127_v37 = vld [vmem:[%s3643_s1 + $0x198] sm:$0xf0]  ;;  %v2342_v1 = vld [vmem:[%s3643_s1 + $0x4] sm:$0xf] }
  0x5a   : > { %998 = vmatpush.bf16.msra.mxu2 %v3018_v31  ;;  %969 = vmatpush.bf16.msrb.mxu1 %v3058_v39  ;;  %v3107_v31 = vor.u32 %v2378_v43, %v2071_v9  ;;  %v2362_v43 = vld [vmem:[%s3643_s1 + $0xa4] sm:$0xf]  ;;  %v2344_v9 = vld [vmem:[%s3643_s1 + $0x14] sm:$0xf]  ;;  %v1999_v57 = vld [vmem:[%s3643_s1 + $0x98] sm:$0xf0] }
  0x5b   : > { %1027 = vmatpush.bf16.msra.mxu3 %v3032_v24  ;;  %v1887_v24 = vld [vmem:[%s2696_s28 + $0x38] sm:$0xf0]  ;;  %v3129_v27 = vor.u32 %v2362_v43, %v2007_v25  ;;  %3690 = vst [vmem:[#allocation20_spill] sm:$0xff] %v3142_v55  ;;  %v2360_v25 = vld [vmem:[%s3643_s1 + $0x94] sm:$0xf] }
  0x5c   : > { %3688 = vst [vmem:[#allocation18_spill] sm:$0xff] %v3107_v31  ;;  %v3114_v19 = vor.u32 %v2435_v59, %v1887_v24  ;;  %v2392_v24 = vld [vmem:[%s3643_s1 + $0x194] sm:$0xf]  ;;  %v1935_v59 = vld [vmem:[%s3643_s1 + $0x18] sm:$0xf0] }
  0x5d   : > { %892 = vmatmul.bf16.gmra.mxu2 %v3109_v38  ;;  %942 = vmatpush.bf16.msrb.mxu0 %v3117_v47  ;;  %v3154_v61 = vor.u32 %v2392_v24, %v2127_v37  ;;  %v3156_v43 = vor.u32 %v2344_v9, %v1935_v59  ;;  %v1927_v24 = vld [vmem:[%s3643_s1 + $0x8] sm:$0xf0]  ;;  %v2374_v37 = vld [vmem:[%s3643_s1 + $0x104] sm:$0xf] }
  0x5e   : > { %999 = vmatpush.bf16.msra.mxu2 %v3068_v48  ;;  %970 = vmatpush.bf16.msrb.mxu1 %v3098_v18  ;;  %v2055_v9 = vld [vmem:[%s3643_s1 + $0x108] sm:$0xf0]  ;;  %v3181_v59 = vor.u32 %v2342_v1, %v1927_v24  ;;  %v1919_v48 = vld [vmem:[%s2696_s28 + $0x78] sm:$0xf0] }
  0x5f   : > { %1028 = vmatpush.bf16.msra.mxu3 %v3078_v52  ;;  %3691 = vst [vmem:[#allocation21_spill] sm:$0xff] %v3154_v61  ;;  %v1991_v52 = vld [vmem:[%s3643_s1 + $0x88] sm:$0xf0] }
  0x60   : > { %921 = vmatmul.bf16.gmra.mxu3 %v3114_v19  ;;  %v2119_v1 = vld [vmem:[%s3643_s1 + $0x188] sm:$0xf0] }
  0x61   : > { %943 = vmatpush.bf16.msrb.mxu0 %v3156_v43 }
  0x62   : > { %1000 = vmatpush.bf16.msra.mxu2 %v3107_v31  ;;  %971 = vmatpush.bf16.msrb.mxu1 %v3129_v27  ;;  %v2439_v31 = vld [vmem:[%s2696_s28 + $0x4c] sm:$0xf] }
  0x63   : > { %1029 = vmatpush.bf16.msra.mxu3 %v3112_v58  ;;  %v3168_v58 = vor.u32 %v2360_v25, %v1999_v57  ;;  %v3183_v25 = vor.u32 %v2374_v37, %v2055_v9  ;;  %v2358_v57 = vld [vmem:[%s3643_s1 + $0x84] sm:$0xf]  ;;  %v1901_v37 = vld [vmem:[%s2696_s28 + $0x48] sm:$0xf]  ;;  %v2441_v9 = vld [vmem:[%s2696_s28 + $0x54] sm:$0xf0] }
  0x65   : > { %3692 = vst [vmem:[#allocation22_spill] sm:$0xff] %v3183_v25  ;;  %944 = vmatpush.bf16.msrb.mxu0 %v3181_v59 }
  0x66   : > { %1001 = vmatpush.bf16.msra.mxu2 %v3142_v55  ;;  %972 = vmatpush.bf16.msrb.mxu1 %v3168_v58  ;;  %v3195_v55 = vor.u32 %v2358_v57, %v1991_v52  ;;  %v1903_v52 = vld [vmem:[%s2696_s28 + $0x58] sm:$0xf0] }
  0x67   : > { %1030 = vmatpush.bf16.msra.mxu3 %v3154_v61  ;;  %v2390_v61 = vld [vmem:[%s3643_s1 + $0x184] sm:$0xf]  ;;  %v1906_v57 = vor.u32 %v2439_v31, %v1903_v52  ;;  %v3335_v52 = vld [vmem:[%s3645_s3 + $0x68] sm:$0xff] }
  0x68   : > { %v3200_v24 = vor.u32 %v2390_v61, %v2119_v1  ;;  %v1902_v61 = vor.u32 %v2441_v9, %v1901_v37  ;;  %945 = vmatmul.bf16.vlgmr.msrb.gmra.mxu0 %v2772_v12  ;;  %v1917_v1 = vld [vmem:[%s2696_s28 + $0x68] sm:$0xf] }
  0x6a   : > { %3693 = vst [vmem:[#allocation23_spill] sm:$0xff] %v3200_v24  ;;  %1002 = vmatpush.bf16.msra.mxu2 %v3183_v25  ;;  %973 = vmatpush.bf16.msrb.mxu1 %v3195_v55  ;;  %v2443_v25 = vld [vmem:[%s2696_s28 + $0x6c] sm:$0xf] }
  0x6b   : > { %1031 = vmatpush.bf16.msra.mxu3 %v3200_v24  ;;  %v2445_v24 = vld [vmem:[%s2696_s28 + $0x74] sm:$0xf0]  ;;  %v1922_v12 = vor.u32 %v2443_v25, %v1919_v48  ;;  %v3302_v48 = vld [vmem:[%s3645_s3] sm:$0xff] }
  0x6d   : > { %974 = vmatmul.bf16.vlgmr.msrb.gmra.mxu1 %v2789_v21  ;;  %897 = vmatmul.bf16.gmra.mxu2 %v1902_v61  ;;  %v3278_v21 = vld [vmem:[%s3645_s3 + $0x18] sm:$0xff] }
  0x6f   : > { %1430 = vmatpush.bf16.msrb.mxu3 %v2553_v3  ;;  %v1918_v3 = vor.u32 %v2445_v24, %v1917_v1 }
  0x70   : > { %926 = vmatmul.bf16.gmra.mxu3 %v1906_v57 }
  0x73   : > { %1431 = vmatpush.bf16.msrb.mxu3 %v2573_v10  ;;  %v3242_v10 = vld [vmem:[%s3645_s3 + $0x38] sm:$0xff] }
  0x74   : > { %1176 = vmatpush.bf16.msra.mxu0 %v3242_v10 }
  0x77   : > { %1432 = vmatpush.bf16.msrb.mxu3 %v2593_v16  ;;  %v3248_v16 = vld [vmem:[%s3645_s3 + $0x30] sm:$0xff] }
  0x78   : > { %950 = vmatmul.bf16.gmra.mxu0 %v2870_v5 }
  0x79   : > { %1177 = vmatpush.bf16.msra.mxu0 %v3248_v16 }
  0x7b   : > { %1433 = vmatpush.bf16.msrb.mxu3 %v2615_v22  ;;  %v3256_v22 = vld [vmem:[%s3645_s3 + $0x28] sm:$0xff] }
  0x7d   : > { %979 = vmatmul.bf16.gmra.mxu1 %v2896_v30  ;;  %902 = vmatmul.bf16.gmra.mxu2 %v1918_v3 }
  0x7e   : > { %1178 = vmatpush.bf16.msra.mxu0 %v3256_v22 }
  0x7f   : > { %1434 = vmatpush.bf16.msrb.mxu3 %v2635_v28  ;;  %v3261_v28 = vld [vmem:[%s3644_s2] sm:$0x3] }
  0x80   : > { %931 = vmatmul.bf16.gmra.mxu3 %v1922_v12 }
  0x83   : > { %1435 = vmatpush.bf16.msrb.mxu3 %v2657_v34  ;;  %v3267_v34 = vld [vmem:[%s3645_s3 + $0x20] sm:$0xff] }
  0x84   : > { %1179 = vmatpush.bf16.msra.mxu0 %v3267_v34 }
  0x87   : > { %1436 = vmatpush.bf16.msrb.mxu3 %v2678_v40  ;;  %v3271_v40 = vperm.slane %v3261_v28, 0 }
  0x88   : > { %955 = vmatmul.bf16.gmra.mxu0 %v2736_v60 }
  0x89   : > { %1180 = vmatpush.bf16.msra.mxu0 %v3278_v21 }
  0x8b   : > { %1437 = vmatpush.bf16.msrb.mxu3 %v2715_v50 }
  0x8d   : > { %984 = vmatmul.bf16.gmra.mxu1 %v2745_v63  ;;  %1003 = vmatmul.bf16.vlgmr.msra.gmra.mxu2 %v2959_v20 }
  0x90   : > { %1032 = vmatmul.bf16.vlgmr.msra.gmra.mxu3 %v2971_v32 }
  0x91   : > { %1546 = vmatpush.bf16.msra.mxu3 %v2908_v36  ;;  %v3296_v36 = vld [vmem:[%s3645_s3 + $0x8] sm:$0xff] }
  0x95   : > { %1547 = vmatpush.bf16.msra.mxu3 %v2943_v62 }
  0x98   : > { %960 = vmatmul.bf16.gmra.mxu0 %v2832_v46 }
  0x99   : > { %1548 = vmatpush.bf16.msra.mxu3 %v3020_v33 }
  0x9d   : > { %989 = vmatmul.bf16.gmra.mxu1 %v2840_v49  ;;  %1549 = vmatpush.bf16.msra.mxu3 %v3049_v8  ;;  %v3286_v49 = vld [vmem:[%s3645_s3 + $0x10] sm:$0xff]  ;;  %v3313_v8 = vld [vmem:[%s3645_s3 + $0x78] sm:$0xff] }
  0x9e   : > { %1008 = vmatmul.bf16.gmra.mxu2 %v3109_v38  ;;  %1181 = vmatpush.bf16.msra.mxu0 %v3286_v49 }
  0x9f   : > { %1205 = vmatpush.bf16.msra.mxu1 %v3313_v8 }
  0xa0   : > { %1037 = vmatmul.bf16.gmra.mxu3 %v3114_v19 }
  0xa1   : > { %1550 = vmatpush.bf16.msra.mxu3 %v3094_v4 }
  0xa2   : > { %1182 = vmatpush.bf16.msra.mxu0 %v3296_v36 }
  0xa5   : > { %1551 = vmatpush.bf16.msra.mxu3 %v3117_v47 }
  0xa6   : > { %1183 = vmatpush.bf16.msra.mxu0 %v3302_v48 }
  0xa9   : > { %1552 = vmatpush.bf16.msra.mxu3 %v3156_v43 }
  0xaa   : > { %v830_v20 = vpop.f32.mrf.mxu0  ;;  %1459 = vmatpush.bf16.msrb.mxu0 %v2564_v7 }
  0xab   : > { %v831_v47 = vadd.f32 %v830_v20, %v3271_v40 }
  0xac   : > { %v859_v33 = vpop.f32.mrf.mxu1 }
  0xad   : > { %1553 = vmatpush.bf16.msra.mxu3 %v3181_v59  ;;  %v860_v25 = vadd.f32 %v859_v33, %v831_v47 }
  0xae   : > { %1013 = vmatmul.bf16.gmra.mxu2 %v1902_v61  ;;  %1460 = vmatpush.bf16.msrb.mxu0 %v2577_v11  ;;  %v3326_v11 = vld [vmem:[%s3645_s3 + $0x70] sm:$0xff] }
  0xaf   : > { %1206 = vmatpush.bf16.msra.mxu1 %v3326_v11 }
  0xb0   : > { %1042 = vmatmul.bf16.gmra.mxu3 %v1906_v57  ;;  %v840_v50 = vpop.f32.mrf.mxu2 }
  0xb1   : > { %v841_v60 = vadd.f32 %v840_v50, %v3271_v40  ;;  %v869_v63 = vpop.f32.mrf.mxu3 }
  0xb2   : > { %1461 = vmatpush.bf16.msrb.mxu0 %v2597_v17  ;;  %v832_v19 = vpop.f32.mrf.mxu0 }
  0xb3   : > { %v3280_v46 = vadd.f32 %v869_v63, %v841_v60  ;;  %v833_v24 = vadd.f32 %v832_v19, %v3271_v40  ;;  %1207 = vmatpush.bf16.msra.mxu1 %v3335_v52  ;;  %v3344_v63 = vld [vmem:[%s3645_s3 + $0x60] sm:$0xff] }
  0xb4   : > { %v861_v43 = vpop.f32.mrf.mxu1 }
  0xb5   : > { %v862_v9 = vadd.f32 %v861_v43, %v833_v24  ;;  %v3352_v43 = vld [vmem:[%s3645_s3 + $0x58] sm:$0xff] }
  0xb6   : > { %1462 = vmatpush.bf16.msrb.mxu0 %v2619_v23 }
  0xb7   : > { %1208 = vmatpush.bf16.msra.mxu1 %v3344_v63 }
  0xb8   : > { %v3289_v5 = vpop.f32.mrf.mxu2 }
  0xb9   : > { %v3291_v30 = vpop.f32.mrf.mxu3 }
  0xba   : > { %1463 = vmatpush.bf16.msrb.mxu0 %v2639_v29  ;;  %v835_v37 = vpop.f32.mrf.mxu0 }
  0xbb   : > { %v836_v60 = vadd.f32 %v835_v37, %v3271_v40  ;;  %1209 = vmatpush.bf16.msra.mxu1 %v3352_v43 }
  0xbc   : > { %v864_v57 = vpop.f32.mrf.mxu1 }
  0xbe   : > { %1018 = vmatmul.bf16.gmra.mxu2 %v1918_v3  ;;  %1464 = vmatpush.bf16.msrb.mxu0 %v2661_v35 }
  0xc0   : > { %1047 = vmatmul.bf16.gmra.mxu3 %v1922_v12  ;;  %v845_v62 = vpop.f32.mrf.mxu2 }
  0xc1   : > { %v846_v32 = vadd.f32 %v845_v62, %v3271_v40  ;;  %v874_v38 = vpop.f32.mrf.mxu3 }
  0xc2   : > { %1465 = vmatpush.bf16.msrb.mxu0 %v2682_v41  ;;  %v837_v62 = vpop.f32.mrf.mxu0 }
  0xc3   : > { %v3307_v31 = vadd.f32 %v874_v38, %v846_v32  ;;  %v865_v32 = vadd.f32 %v864_v57, %v836_v60  ;;  %v838_v33 = vadd.f32 %v837_v62, %v3271_v40  ;;  %v3380_v62 = vld [vmem:[%s3645_s3 + $0x40] sm:$0xff] }
  0xc6   : > { %1466 = vmatpush.bf16.msrb.mxu0 %v2721_v53  ;;  %v866_v53 = vpop.f32.mrf.mxu1 }
  0xc7   : > { %v867_v47 = vadd.f32 %v866_v53, %v838_v33 }
  0xc8   : > { %v3316_v4 = vpop.f32.mrf.mxu2 }
  0xc9   : > { %v3319_v7 = vpop.f32.mrf.mxu3 }
  0xd0   : > { %v888_v59 = vpop.f32.mrf.mxu2 }
  0xd1   : > { %v917_v17 = vpop.f32.mrf.mxu3  ;;  %v889_v23 = vadd.f32 %v888_v59, %v860_v25 }
  0xd3   : > { %v918_v29 = vadd.f32 %v917_v17, %v889_v23 }
  0xd5   : > { %v1053_v35 = vmax.f32 %v918_v29, 0.0 }
  0xd8   : > { %v890_v61 = vpop.f32.mrf.mxu2 }
  0xd9   : > { %v891_v1 = vadd.f32 %v890_v61, %v862_v9  ;;  %v919_v3 = vpop.f32.mrf.mxu3  ;;  %v3360_v9 = vld [vmem:[%s3645_s3 + $0x50] sm:$0xff] }
  0xda   : > { %1210 = vmatpush.bf16.msra.mxu1 %v3360_v9 }
  0xdb   : > { %v920_v12 = vadd.f32 %v919_v3, %v891_v1  ;;  %v3371_v1 = vld [vmem:[%s3645_s3 + $0x48] sm:$0xff] }
  0xdd   : > { %v1055_v50 = vmax.f32 %v920_v12, 0.0 }
  0xde   : > { %1211 = vmatpush.bf16.msra.mxu1 %v3371_v1 }
  0xdf   : > { %v1069_v20 = vpack.c.bf16 %v1055_v50, %v1053_v35 }
  0xe0   : > { %v893_v41 = vpop.f32.mrf.mxu2 }
  0xe1   : > { %1184 = vmatmul.bf16.vlgmr.msra.gmra.mxu0 %v1069_v20  ;;  %v894_v19 = vadd.f32 %v893_v41, %v865_v32 }
  0xe2   : > { %1575 = vmatpush.bf16.msra.mxu0 %v2922_v45  ;;  %1212 = vmatpush.bf16.msra.mxu1 %v3380_v62 }
  0xe3   : > { %v922_v38 = vpop.f32.mrf.mxu3 }
  0xe4   : > { %v923_v25 = vadd.f32 %v922_v38, %v894_v19 }
  0xe5   : > { %v946_v50 = vpop.f32.mrf.mxu0 }
  0xe6   : > { %1576 = vmatpush.bf16.msra.mxu0 %v2998_v2  ;;  %v1057_v23 = vmax.f32 %v923_v25, 0.0  ;;  %1488 = vmatpush.bf16.msrb.mxu1 %v2725_v56 }
  0xe8   : > { %v895_v59 = vpop.f32.mrf.mxu2 }
  0xe9   : > { %v896_v17 = vadd.f32 %v895_v59, %v867_v47  ;;  %v3392_v47 = vperm.slane %v3261_v28, 1 }
  0xea   : > { %1577 = vmatpush.bf16.msra.mxu0 %v3040_v14  ;;  %v843_v14 = vadd.f32 %v3289_v5, %v3271_v40  ;;  %1489 = vmatpush.bf16.msrb.mxu1 %v2750_v0 }
  0xeb   : > { %v924_v24 = vpop.f32.mrf.mxu3  ;;  %v947_v0 = vadd.f32 %v946_v50, %v3392_v47 }
  0xec   : > { %v925_v37 = vadd.f32 %v924_v24, %v896_v17 }
  0xed   : > { %v948_v32 = vpop.f32.mrf.mxu0 }
  0xee   : > { %v1059_v45 = vmax.f32 %v925_v37, 0.0  ;;  %1578 = vmatpush.bf16.msra.mxu0 %v3058_v39  ;;  %v872_v39 = vadd.f32 %v3291_v30, %v843_v14  ;;  %1490 = vmatpush.bf16.msrb.mxu1 %v2775_v13  ;;  %v949_v28 = vadd.f32 %v948_v32, %v3392_v47  ;;  %v3694_v32 = vld [vmem:[#allocation12_spill] sm:$0xff] }
  0xf0   : > { %v1071_v61 = vpack.c.bf16 %v1059_v45, %v1057_v23  ;;  %v898_v2 = vpop.f32.mrf.mxu2 }
  0xf1   : > { %v899_v29 = vadd.f32 %v898_v2, %v3280_v46 }
  0xf2   : > { %1189 = vmatmul.bf16.gmra.mxu0 %v1071_v61  ;;  %1491 = vmatpush.bf16.msrb.mxu1 %v2799_v26 }
  0xf3   : > { %v927_v57 = vpop.f32.mrf.mxu3  ;;  %1579 = vmatpush.bf16.msra.mxu0 %v3098_v18 }
  0xf4   : > { %v928_v12 = vadd.f32 %v927_v57, %v899_v29 }
  0xf6   : > { %v1061_v46 = vmax.f32 %v928_v12, 0.0  ;;  %1492 = vmatpush.bf16.msrb.mxu1 %v2821_v42 }
  0xf7   : > { %1580 = vmatpush.bf16.msra.mxu0 %v3129_v27  ;;  %v975_v27 = vpop.f32.mrf.mxu1 }
  0xf8   : > { %v900_v3 = vpop.f32.mrf.mxu2  ;;  %v976_v37 = vadd.f32 %v975_v27, %v947_v0  ;;  %v3696_v0 = vld [vmem:[#allocation16_spill] sm:$0xff] }
  0xf9   : > { %v901_v35 = vadd.f32 %v900_v3, %v872_v39 }
  0xfa   : > { %1493 = vmatpush.bf16.msrb.mxu1 %v2843_v51 }
  0xfb   : > { %v929_v18 = vpop.f32.mrf.mxu3  ;;  %1581 = vmatpush.bf16.msra.mxu0 %v3168_v58  ;;  %v848_v58 = vadd.f32 %v3316_v4, %v3271_v40 }
  0xfc   : > { %v930_v5 = vadd.f32 %v929_v18, %v901_v35 }
  0xfd   : > { %v877_v33 = vadd.f32 %v3319_v7, %v848_v58 }
  0xfe   : > { %v1063_v60 = vmax.f32 %v930_v5, 0.0  ;;  %1494 = vmatpush.bf16.msrb.mxu1 %v2873_v6 }
  0xff   : > { %1582 = vmatpush.bf16.msra.mxu0 %v3195_v55  ;;  %v977_v55 = vpop.f32.mrf.mxu1 }
 0x100   : > { %v1073_v30 = vpack.c.bf16 %v1063_v60, %v1061_v46  ;;  %v903_v20 = vpop.f32.mrf.mxu2  ;;  %v978_v61 = vadd.f32 %v977_v55, %v949_v28 }
 0x101   : > { %v904_v38 = vadd.f32 %v903_v20, %v3307_v31  ;;  %v951_v31 = vpop.f32.mrf.mxu0 }
 0x102   : > { %1194 = vmatmul.bf16.gmra.mxu0 %v1073_v30  ;;  %1495 = vmatpush.bf16.msrb.mxu1 %v2920_v44  ;;  %v952_v12 = vadd.f32 %v951_v31, %v3392_v47 }
 0x103   : > { %v932_v41 = vpop.f32.mrf.mxu3 }
 0x104   : > { %v933_v19 = vadd.f32 %v932_v41, %v904_v38 }
 0x106   : > { %v1065_v4 = vmax.f32 %v933_v19, 0.0 }
 0x107   : > { %v980_v23 = vpop.f32.mrf.mxu1 }
 0x108   : > { %v905_v53 = vpop.f32.mrf.mxu2  ;;  %v981_v51 = vadd.f32 %v980_v23, %v952_v12 }
 0x109   : > { %v906_v56 = vadd.f32 %v905_v53, %v877_v33  ;;  %v953_v2 = vpop.f32.mrf.mxu0 }
 0x10a   : > { %v954_v6 = vadd.f32 %v953_v2, %v3392_v47 }
 0x10b   : > { %v934_v59 = vpop.f32.mrf.mxu3 }
 0x10c   : > { %v935_v25 = vadd.f32 %v934_v59, %v906_v56 }
 0x10e   : > { %v1067_v17 = vmax.f32 %v935_v25, 0.0 }
 0x10f   : > { %v982_v3 = vpop.f32.mrf.mxu1 }
 0x110   : > { %v1075_v24 = vpack.c.bf16 %v1067_v17, %v1065_v4  ;;  %v1004_v7 = vpop.f32.mrf.mxu2  ;;  %v983_v30 = vadd.f32 %v982_v3, %v954_v6  ;;  %v3418_v6 = vld [vmem:[%s3647_s5 + $0x38] sm:$0xff] }
 0x111   : > { %v1005_v45 = vadd.f32 %v1004_v7, %v976_v37  ;;  %v956_v46 = vpop.f32.mrf.mxu0  ;;  %v3697_v7 = vld [vmem:[#allocation18_spill] sm:$0xff]  ;;  %1297 = vmatpush.bf16.msrb.mxu2 %v3418_v6 }
 0x112   : > { %1199 = vmatmul.bf16.gmra.mxu0 %v1075_v24  ;;  %v957_v55 = vadd.f32 %v956_v46, %v3392_v47 }
 0x113   : > { %v1033_v13 = vpop.f32.mrf.mxu3 }
 0x114   : > { %v1034_v57 = vadd.f32 %v1033_v13, %v1005_v45 }
 0x116   : > { %v1054_v42 = vmax.f32 %v1034_v57, 0.0 }
 0x117   : > { %v985_v27 = vpop.f32.mrf.mxu1 }
 0x118   : > { %v1006_v26 = vpop.f32.mrf.mxu2  ;;  %v986_v4 = vadd.f32 %v985_v27, %v957_v55  ;;  %v3442_v55 = vld [vmem:[%s3647_s5 + $0x18] sm:$0xff] }
 0x119   : > { %v1007_v14 = vadd.f32 %v1006_v26, %v978_v61  ;;  %v958_v33 = vpop.f32.mrf.mxu0  ;;  %v3698_v26 = vld [vmem:[#allocation20_spill] sm:$0xff] }
 0x11a   : > { %v959_v17 = vadd.f32 %v958_v33, %v3392_v47  ;;  %v3430_v33 = vld [vmem:[%s3647_s5 + $0x28] sm:$0xff] }
 0x11b   : > { %v1035_v29 = vpop.f32.mrf.mxu3 }
 0x11c   : > { %v1036_v39 = vadd.f32 %v1035_v29, %v1007_v14 }
 0x11e   : > { %v1056_v35 = vmax.f32 %v1036_v39, 0.0  ;;  %v3699_v39 = vld [vmem:[#allocation22_spill] sm:$0xff] }
 0x11f   : > { %v987_v59 = vpop.f32.mrf.mxu1 }
 0x120   : > { %v1070_v18 = vpack.c.bf16 %v1056_v35, %v1054_v42  ;;  %v988_v37 = vadd.f32 %v987_v59, %v959_v17  ;;  %v3700_v59 = vld [vmem:[#allocation2_spill] sm:$0xff] }
 0x121   : > { %v1009_v50 = vpop.f32.mrf.mxu2  ;;  %v961_v24 = vpop.f32.mrf.mxu0  ;;  %v3704_v17 = vld [vmem:[#allocation6_spill] sm:$0xff] }
 0x122   : > { %1213 = vmatmul.bf16.vlgmr.msra.gmra.mxu1 %v1070_v18  ;;  %v1010_v60 = vadd.f32 %v1009_v50, %v981_v51  ;;  %v962_v14 = vadd.f32 %v961_v24, %v3392_v47  ;;  %v3705_v24 = vld [vmem:[#allocation7_spill] sm:$0xff] }
 0x123   : > { %v1038_v5 = vpop.f32.mrf.mxu3  ;;  %1604 = vmatpush.bf16.msra.mxu1 %v2930_v54  ;;  %v3695_v54 = vld [vmem:[#allocation14_spill] sm:$0xff] }
 0x124   : > { %v1039_v20 = vadd.f32 %v1038_v5, %v1010_v60 }
 0x126   : > { %v1058_v53 = vmax.f32 %v1039_v20, 0.0 }
 0x127   : > { %1605 = vmatpush.bf16.msra.mxu1 %v2957_v15  ;;  %v990_v61 = vpop.f32.mrf.mxu1 }
 0x128   : > { %v991_v35 = vadd.f32 %v990_v61, %v962_v14 }
 0x129   : > { %v1011_v44 = vpop.f32.mrf.mxu2  ;;  %v963_v42 = vpop.f32.mrf.mxu0 }
 0x12a   : > { %v1012_v41 = vadd.f32 %v1011_v44, %v983_v30  ;;  %v964_v50 = vadd.f32 %v963_v42, %v3392_v47 }
 0x12b   : > { %v1040_v58 = vpop.f32.mrf.mxu3  ;;  %1606 = vmatpush.bf16.msra.mxu1 %v3694_v32 }
 0x12c   : > { %v1041_v38 = vadd.f32 %v1040_v58, %v1012_v41 }
 0x12e   : > { %v1060_v19 = vmax.f32 %v1041_v38, 0.0  ;;  %v3424_v38 = vld [vmem:[%s3647_s5 + $0x30] sm:$0xff] }
 0x12f   : > { %1607 = vmatpush.bf16.msra.mxu1 %v3695_v54  ;;  %v992_v51 = vpop.f32.mrf.mxu1  ;;  %1298 = vmatpush.bf16.msrb.mxu2 %v3424_v38  ;;  %v3454_v54 = vld [vmem:[%s3647_s5 + $0x8] sm:$0xff] }
 0x130   : > { %v1072_v56 = vpack.c.bf16 %v1060_v19, %v1058_v53  ;;  %v993_v46 = vadd.f32 %v992_v51, %v964_v50  ;;  %v3436_v53 = vld [vmem:[%s3647_s5 + $0x20] sm:$0xff]  ;;  %v3448_v19 = vld [vmem:[%s3647_s5 + $0x10] sm:$0xff] }
 0x131   : > { %v1014_v25 = vpop.f32.mrf.mxu2 }
 0x132   : > { %1218 = vmatmul.bf16.gmra.mxu1 %v1072_v56  ;;  %v1015_v31 = vadd.f32 %v1014_v25, %v986_v4  ;;  %v3460_v56 = vld [vmem:[%s3647_s5] sm:$0xff]  ;;  %v3701_v25 = vld [vmem:[#allocation3_spill] sm:$0xff] }
 0x133   : > { %v1043_v15 = vpop.f32.mrf.mxu3  ;;  %1608 = vmatpush.bf16.msra.mxu1 %v3696_v0  ;;  %1299 = vmatpush.bf16.msrb.mxu2 %v3430_v33  ;;  %v3703_v0 = vld [vmem:[#allocation5_spill] sm:$0xff] }
 0x134   : > { %v1044_v23 = vadd.f32 %v1043_v15, %v1015_v31  ;;  %v3702_v15 = vld [vmem:[#allocation4_spill] sm:$0xff] }
 0x136   : > { %v1062_v57 = vmax.f32 %v1044_v23, 0.0 }
 0x137   : > { %1609 = vmatpush.bf16.msra.mxu1 %v3697_v7  ;;  %1300 = vmatpush.bf16.msrb.mxu2 %v3436_v53  ;;  %v3706_v7 = vld [vmem:[#allocation8_spill] sm:$0xff] }
 0x139   : > { %v1016_v13 = vpop.f32.mrf.mxu2 }
 0x13a   : > { %v1017_v28 = vadd.f32 %v1016_v13, %v988_v37  ;;  %v3473_v13 = vld [vmem:[%s3646_s4] ss:$0 sm:$0xff] }
 0x13b   : > { %v1045_v45 = vpop.f32.mrf.mxu3  ;;  %1610 = vmatpush.bf16.msra.mxu1 %v3698_v26  ;;  %1301 = vmatpush.bf16.msrb.mxu2 %v3442_v55 }
 0x13c   : > { %v1046_v2 = vadd.f32 %v1045_v45, %v1017_v28  ;;  %v3707_v28 = vld [vmem:[#allocation9_spill] sm:$0xff] }
 0x13e   : > { %v1064_v29 = vmax.f32 %v1046_v2, 0.0 }
 0x13f   : > { %1611 = vmatpush.bf16.msra.mxu1 %v3699_v39  ;;  %1302 = vmatpush.bf16.msrb.mxu2 %v3448_v19 }
 0x140   : > { %v1074_v3 = vpack.c.bf16 %v1064_v29, %v1062_v57 }
 0x141   : > { %v1019_v12 = vpop.f32.mrf.mxu2 }
 0x142   : > { %1223 = vmatmul.bf16.gmra.mxu1 %v1074_v3  ;;  %v1020_v5 = vadd.f32 %v1019_v12, %v991_v35  ;;  %v3708_v12 = vld [vmem:[#allocation10_spill] sm:$0xff]  ;;  %v3709_v35 = vld [vmem:[#allocation11_spill] sm:$0xff] }
 0x143   : > { %v1048_v18 = vpop.f32.mrf.mxu3  ;;  %1303 = vmatpush.bf16.msrb.mxu2 %v3454_v54 }
 0x144   : > { %v1049_v27 = vadd.f32 %v1048_v18, %v1020_v5 }
 0x146   : > { %v1066_v41 = vmax.f32 %v1049_v27, 0.0 }
 0x147   : > { %1304 = vmatpush.bf16.msrb.mxu2 %v3460_v56 }
 0x149   : > { %v1021_v60 = vpop.f32.mrf.mxu2 }
 0x14a   : > { %v1022_v30 = vadd.f32 %v1021_v60, %v993_v46  ;;  %v3710_v60 = vld [vmem:[#allocation13_spill] sm:$0xff] }
 0x14b   : > { %v1050_v44 = vpop.f32.mrf.mxu3  ;;  %1517 = vmatpush.bf16.msra.mxu2 %v3700_v59  ;;  %v2446_v59 = vld [vmem:[%s2696_s28 + $0x84] sm:$0xf] }
 0x14c   : > { %v1051_v20 = vadd.f32 %v1050_v44, %v1022_v30 }
 0x14e   : > { %v1068_v58 = vmax.f32 %v1051_v20, 0.0  ;;  %v3711_v20 = vld [vmem:[#allocation15_spill] sm:$0xff] }
 0x14f   : > { %1518 = vmatpush.bf16.msra.mxu2 %v3701_v25 }
 0x150   : > { %v1076_v32 = vpack.c.bf16 %v1068_v58, %v1066_v41  ;;  %v2277_v58 = vld [vmem:[%s2696_s28 + $0x80] sm:$0xf] }
 0x152   : > { %1228 = vmatmul.bf16.gmra.mxu1 %v1076_v32  ;;  %v2448_v32 = vld [vmem:[%s2696_s28 + $0x8c] sm:$0xf0] }
 0x153   : > { %1519 = vmatpush.bf16.msra.mxu2 %v3702_v15  ;;  %v3487_v15 = vor.u32 %v2448_v32, %v2277_v58  ;;  %v2327_v58 = vld [vmem:[%s2696_s28 + $0xf0] sm:$0xf0]  ;;  %v2333_v32 = vld [vmem:[%s2696_s28 + $0xe8] sm:$0xf] }
 0x155   : > { %1438 = vmatmul.bf16.vlgmr.msrb.gmra.mxu3 %v3487_v15 }
 0x156   : > { %1686 = vmatpush.bf16.msrb.mxu3 %v3242_v10 }
 0x157   : > { %1520 = vmatpush.bf16.msra.mxu2 %v3703_v0  ;;  %v2279_v0 = vld [vmem:[%s2696_s28 + $0x90] sm:$0xf0] }
 0x15a   : > { %1687 = vmatpush.bf16.msrb.mxu3 %v3248_v16  ;;  %v2293_v16 = vld [vmem:[%s2696_s28 + $0xa0] sm:$0xf] }
 0x15b   : > { %1521 = vmatpush.bf16.msra.mxu2 %v3704_v17  ;;  %v2285_v17 = vld [vmem:[%s2696_s28 + $0x88] sm:$0xf] }
 0x15e   : > { %v1185_v4 = vpop.f32.mrf.mxu0  ;;  %1688 = vmatpush.bf16.msrb.mxu3 %v3256_v22 }
 0x15f   : > { %1522 = vmatpush.bf16.msra.mxu2 %v3705_v24  ;;  %v1186_v45 = vadd.f32 %v3473_v13, %v1185_v4  ;;  %v3712_v24 = vld [vmem:[#allocation17_spill] sm:$0xff] }
 0x162   : > { %1689 = vmatpush.bf16.msrb.mxu3 %v3267_v34 }
 0x163   : > { %1523 = vmatpush.bf16.msra.mxu2 %v3706_v7  ;;  %v3493_v7 = vor.u32 %v2446_v59, %v2279_v0 }
 0x165   : > { %1467 = vmatmul.bf16.vlgmr.msrb.gmra.mxu0 %v3493_v7 }
 0x166   : > { %v1187_v31 = vpop.f32.mrf.mxu0  ;;  %1715 = vmatpush.bf16.msrb.mxu0 %v3313_v8  ;;  %1690 = vmatpush.bf16.msrb.mxu3 %v3278_v21 }
 0x167   : > { %1524 = vmatpush.bf16.msra.mxu2 %v3707_v28  ;;  %v1188_v61 = vadd.f32 %v3473_v13, %v1187_v31  ;;  %v2449_v31 = vld [vmem:[%s2696_s28 + $0x94] sm:$0xf0] }
 0x16a   : > { %1716 = vmatpush.bf16.msrb.mxu0 %v3326_v11  ;;  %v2452_v11 = vld [vmem:[%s2696_s28 + $0xac] sm:$0xf0]  ;;  %1691 = vmatpush.bf16.msrb.mxu3 %v3286_v49 }
 0x16b   : > { %v2456_v49 = vld [vmem:[%s2696_s28 + $0xcc] sm:$0xf0] }
 0x16e   : > { %1717 = vmatpush.bf16.msrb.mxu0 %v3335_v52  ;;  %1692 = vmatpush.bf16.msrb.mxu3 %v3296_v36 }
 0x16f   : > { %v1190_v23 = vpop.f32.mrf.mxu0 }
 0x170   : > { %v1191_v18 = vadd.f32 %v3473_v13, %v1190_v23  ;;  %v3713_v23 = vld [vmem:[#allocation19_spill] sm:$0xff] }
 0x172   : > { %1718 = vmatpush.bf16.msrb.mxu0 %v3344_v63  ;;  %1693 = vmatpush.bf16.msrb.mxu3 %v3302_v48  ;;  %v2460_v48 = vld [vmem:[%s2696_s28 + $0xec] sm:$0xf0] }
 0x176   : > { %1719 = vmatpush.bf16.msrb.mxu0 %v3352_v43 }
 0x177   : > { %v1192_v39 = vpop.f32.mrf.mxu0 }
 0x178   : > { %v1193_v51 = vadd.f32 %v3473_v13, %v1192_v39  ;;  %v2450_v39 = vld [vmem:[%s2696_s28 + $0xa4] sm:$0xf] }
 0x17a   : > { %1720 = vmatpush.bf16.msrb.mxu0 %v3360_v9  ;;  %v2311_v9 = vld [vmem:[%s2696_s28 + $0xd0] sm:$0xf0] }
 0x17e   : > { %1721 = vmatpush.bf16.msrb.mxu0 %v3371_v1 }
 0x17f   : > { %v1195_v50 = vpop.f32.mrf.mxu0 }
 0x180   : > { %v1196_v28 = vadd.f32 %v3473_v13, %v1195_v50 }
 0x182   : > { %1722 = vmatpush.bf16.msrb.mxu0 %v3380_v62  ;;  %v2461_v62 = vld [vmem:[%s2696_s28 + $0xf4] sm:$0xf0] }
 0x187   : > { %v1197_v25 = vpop.f32.mrf.mxu0 }
 0x18f   : > { %v1200_v10 = vpop.f32.mrf.mxu0 }
 0x197   : > { %v1202_v52 = vpop.f32.mrf.mxu0 }
 0x198   : > { %v1203_v34 = vadd.f32 %v3473_v13, %v1202_v52 }
 0x19f   : > { %v1214_v37 = vpop.f32.mrf.mxu1 }
 0x1a0   : > { %v1215_v26 = vadd.f32 %v1214_v37, %v1186_v45  ;;  %v3495_v37 = vor.u32 %v2449_v31, %v2285_v17  ;;  %v1198_v45 = vadd.f32 %v3473_v13, %v1197_v25  ;;  %v2451_v25 = vld [vmem:[%s2696_s28 + $0xac] sm:$0xf]  ;;  %v2319_v31 = vld [vmem:[%s2696_s28 + $0xd8] sm:$0xf0] }
 0x1a1   : > { %v2455_v17 = vld [vmem:[%s2696_s28 + $0xcc] sm:$0xf] }
 0x1a2   : > { %v1234_v14 = vmax.f32 %v1215_v26, 0.0  ;;  %1496 = vmatmul.bf16.vlgmr.msrb.gmra.mxu1 %v3495_v37 }
 0x1a3   : > { %1756 = vmatpush.bf16.msrb.mxu1 %v3418_v6 }
 0x1a7   : > { %v1216_v2 = vpop.f32.mrf.mxu1  ;;  %1757 = vmatpush.bf16.msrb.mxu1 %v3424_v38  ;;  %v3517_v38 = vor.u32 %v2452_v11, %v2293_v16 }
 0x1a8   : > { %v1217_v57 = vadd.f32 %v1216_v2, %v1188_v61  ;;  %v3714_v2 = vld [vmem:[#allocation21_spill] sm:$0xff] }
 0x1a9   : > { %1443 = vmatmul.bf16.gmra.mxu3 %v3517_v38 }
 0x1aa   : > { %v1235_v29 = vmax.f32 %v1217_v57, 0.0 }
 0x1ab   : > { %1758 = vmatpush.bf16.msrb.mxu1 %v3430_v33  ;;  %v1201_v33 = vadd.f32 %v3473_v13, %v1200_v10 }
 0x1ac   : > { %v1242_v3 = vpack.c.bf16 %v1235_v29, %v1234_v14  ;;  %v3715_v14 = vld [vmem:[#allocation23_spill] sm:$0xff] }
 0x1ae   : > { %1305 = vmatmul.bf16.vlgmr.msrb.gmra.mxu2 %v1242_v3 }
 0x1af   : > { %v1219_v42 = vpop.f32.mrf.mxu1  ;;  %1633 = vmatpush.bf16.msrb.mxu2 %v3708_v12  ;;  %v2301_v12 = vld [vmem:[%s2696_s28 + $0xa8] sm:$0xf]  ;;  %1759 = vmatpush.bf16.msrb.mxu1 %v3436_v53 }
 0x1b0   : > { %v1220_v5 = vadd.f32 %v1219_v42, %v1191_v18  ;;  %v2295_v42 = vld [vmem:[%s2696_s28 + $0xb0] sm:$0xf0] }
 0x1b1   : > { %v3523_v18 = vor.u32 %v2450_v39, %v2295_v42 }
 0x1b2   : > { %v1236_v30 = vmax.f32 %v1220_v5, 0.0  ;;  %v2454_v5 = vld [vmem:[%s2696_s28 + $0xc4] sm:$0xf] }
 0x1b3   : > { %1634 = vmatpush.bf16.msrb.mxu2 %v3709_v35  ;;  %v2453_v35 = vld [vmem:[%s2696_s28 + $0xb4] sm:$0xf0]  ;;  %1472 = vmatmul.bf16.gmra.mxu0 %v3523_v18  ;;  %v2314_v36 = vor.u32 %v2454_v5, %v2311_v9 }
 0x1b4   : > { %v3525_v22 = vor.u32 %v2453_v35, %v2301_v12  ;;  %1760 = vmatpush.bf16.msrb.mxu1 %v3442_v55 }
 0x1b6   : > { %1501 = vmatmul.bf16.gmra.mxu1 %v3525_v22 }
 0x1b7   : > { %v1221_v46 = vpop.f32.mrf.mxu1  ;;  %1635 = vmatpush.bf16.msrb.mxu2 %v3710_v60  ;;  %v2457_v60 = vld [vmem:[%s2696_s28 + $0xd4] sm:$0xf0] }
 0x1b8   : > { %v1222_v27 = vadd.f32 %v1221_v46, %v1193_v51  ;;  %1761 = vmatpush.bf16.msrb.mxu1 %v3448_v19  ;;  %v2309_v51 = vld [vmem:[%s2696_s28 + $0xc0] sm:$0xf]  ;;  %v2317_v19 = vld [vmem:[%s2696_s28 + $0xc8] sm:$0xf] }
 0x1b9   : > { %v2310_v46 = vor.u32 %v2456_v49, %v2309_v51  ;;  %v2318_v1 = vor.u32 %v2457_v60, %v2317_v19 }
 0x1ba   : > { %v1237_v44 = vmax.f32 %v1222_v27, 0.0  ;;  %v2287_v27 = vld [vmem:[%s2696_s28 + $0x98] sm:$0xf0] }
 0x1bb   : > { %1636 = vmatpush.bf16.msrb.mxu2 %v3711_v20  ;;  %1448 = vmatmul.bf16.gmra.mxu3 %v2310_v46  ;;  %v2458_v20 = vld [vmem:[%s2696_s28 + $0xe4] sm:$0xf] }
 0x1bc   : > { %v1243_v41 = vpack.c.bf16 %v1237_v44, %v1236_v30  ;;  %1762 = vmatpush.bf16.msrb.mxu1 %v3454_v54  ;;  %v2447_v54 = vld [vmem:[%s2696_s28 + $0x8c] sm:$0xf]  ;;  %v2325_v44 = vld [vmem:[%s2696_s28 + $0xe0] sm:$0xf]  ;;  %v2330_v59 = vor.u32 %v2458_v20, %v2327_v58 }
 0x1bd   : > { %v2290_v30 = vor.u32 %v2447_v54, %v2287_v27 }
 0x1be   : > { %1310 = vmatmul.bf16.gmra.mxu2 %v1243_v41  ;;  %v2326_v41 = vor.u32 %v2460_v48, %v2325_v44 }
 0x1bf   : > { %v1224_v4 = vpop.f32.mrf.mxu1  ;;  %1637 = vmatpush.bf16.msrb.mxu2 %v3712_v24  ;;  %v2322_v24 = vor.u32 %v2455_v17, %v2319_v31 }
 0x1c0   : > { %v1225_v61 = vadd.f32 %v1224_v4, %v1196_v28  ;;  %1763 = vmatpush.bf16.msrb.mxu1 %v3460_v56  ;;  %v2334_v56 = vor.u32 %v2461_v62, %v2333_v32  ;;  %v2303_v4 = vld [vmem:[%s2696_s28 + $0xb8] sm:$0xf0] }
 0x1c1   : > { %v2306_v0 = vor.u32 %v2451_v25, %v2303_v4  ;;  %v2335_v28 = vld [vmem:[%s2696_s28 + $0xf8] sm:$0xf0] }
 0x1c2   : > { %v1238_v8 = vmax.f32 %v1225_v61, 0.0 }
 0x1c3   : > { %1638 = vmatpush.bf16.msrb.mxu2 %v3713_v23  ;;  %1477 = vmatmul.bf16.gmra.mxu0 %v2314_v36  ;;  %v2459_v23 = vld [vmem:[%s2696_s28 + $0xec] sm:$0xf] }
 0x1c6   : > { %1506 = vmatmul.bf16.gmra.mxu1 %v2318_v1 }
 0x1c7   : > { %v1226_v26 = vpop.f32.mrf.mxu1  ;;  %1639 = vmatpush.bf16.msrb.mxu2 %v3714_v2 }
 0x1c8   : > { %v1227_v57 = vadd.f32 %v1226_v26, %v1198_v45  ;;  %v2338_v45 = vor.u32 %v2459_v23, %v2335_v28 }
 0x1ca   : > { %v1239_v6 = vmax.f32 %v1227_v57, 0.0 }
 0x1cb   : > { %1640 = vmatpush.bf16.msrb.mxu2 %v3715_v14  ;;  %1453 = vmatmul.bf16.gmra.mxu3 %v2326_v41 }
 0x1cc   : > { %v1244_v29 = vpack.c.bf16 %v1239_v6, %v1238_v8 }
 0x1ce   : > { %1315 = vmatmul.bf16.gmra.mxu2 %v1244_v29 }
 0x1cf   : > { %v1229_v3 = vpop.f32.mrf.mxu1 }
 0x1d0   : > { %v1230_v63 = vadd.f32 %v1229_v3, %v1201_v33 }
 0x1d2   : > { %v1240_v21 = vmax.f32 %v1230_v63, 0.0 }
 0x1d3   : > { %1482 = vmatmul.bf16.gmra.mxu0 %v2330_v59 }
 0x1d6   : > { %1511 = vmatmul.bf16.gmra.mxu1 %v2334_v56 }
 0x1d7   : > { %v1231_v53 = vpop.f32.mrf.mxu1 }
 0x1d8   : > { %v1232_v50 = vadd.f32 %v1231_v53, %v1203_v34  ;;  %v1439_v10 = vpop.f32.mrf.mxu3 }
 0x1da   : > { %v1241_v43 = vmax.f32 %v1232_v50, 0.0 }
 0x1db   : > { %1554 = vmatmul.bf16.vlgmr.msra.gmra.mxu3 %v3487_v15  ;;  %v3576_v15 = vld [vmem:[%s3648_s6] ss:$0 sm:$0xff] }
 0x1dc   : > { %v1245_v55 = vpack.c.bf16 %v1241_v43, %v1240_v21  ;;  %v1440_v21 = vadd.f32 %v1439_v10, %v3271_v40 }
 0x1de   : > { %1320 = vmatmul.bf16.gmra.mxu2 %v1245_v55 }
 0x1e0   : > { %v1441_v11 = vpop.f32.mrf.mxu3 }
 0x1e1   : > { %v1442_v49 = vadd.f32 %v1441_v11, %v3271_v40 }
 0x1e2   : > { %v1468_v14 = vpop.f32.mrf.mxu0 }
 0x1e3   : > { %1583 = vmatmul.bf16.vlgmr.msra.gmra.mxu0 %v3493_v7  ;;  %v1469_v51 = vadd.f32 %v1468_v14, %v1440_v21 }
 0x1e6   : > { %1612 = vmatmul.bf16.vlgmr.msra.gmra.mxu1 %v3495_v37 }
 0x1ea   : > { %v1470_v3 = vpop.f32.mrf.mxu0 }
 0x1eb   : > { %1559 = vmatmul.bf16.gmra.mxu3 %v3517_v38  ;;  %v1471_v19 = vadd.f32 %v1470_v3, %v1442_v49 }
 0x1ee   : > { %1525 = vmatmul.bf16.vlgmr.msra.gmra.mxu2 %v2290_v30 }
 0x1f3   : > { %1588 = vmatmul.bf16.gmra.mxu0 %v3523_v18 }
 0x1f6   : > { %1617 = vmatmul.bf16.gmra.mxu1 %v3525_v22 }
 0x1fb   : > { %1564 = vmatmul.bf16.gmra.mxu3 %v2310_v46 }
 0x1fe   : > { %1530 = vmatmul.bf16.gmra.mxu2 %v2306_v0 }
 0x203   : > { %1593 = vmatmul.bf16.gmra.mxu0 %v2314_v36 }
 0x206   : > { %1622 = vmatmul.bf16.gmra.mxu1 %v2318_v1 }
 0x20b   : > { %1569 = vmatmul.bf16.gmra.mxu3 %v2326_v41 }
 0x20e   : > { %1535 = vmatmul.bf16.gmra.mxu2 %v2322_v24 }
 0x213   : > { %1598 = vmatmul.bf16.gmra.mxu0 %v2330_v59 }
 0x216   : > { %1627 = vmatmul.bf16.gmra.mxu1 %v2334_v56 }
 0x21e   : > { %1540 = vmatmul.bf16.gmra.mxu2 %v2338_v45 }
 0x21f   : > { %v1497_v29 = vpop.f32.mrf.mxu1 }
 0x220   : > { %v1498_v9 = vadd.f32 %v1497_v29, %v1469_v51 }
 0x227   : > { %v1499_v42 = vpop.f32.mrf.mxu1 }
 0x228   : > { %v1500_v36 = vadd.f32 %v1499_v42, %v1471_v19 }
 0x22c   : > { %v1444_v35 = vpop.f32.mrf.mxu3 }
 0x22d   : > { %v1445_v48 = vadd.f32 %v1444_v35, %v3271_v40 }
 0x22e   : > { %1641 = vmatmul.bf16.vlgmr.msrb.gmra.mxu2 %v2290_v30 }
 0x230   : > { %v1473_v18 = vpop.f32.mrf.mxu0 }
 0x231   : > { %v1306_v7 = vpop.f32.mrf.mxu2  ;;  %v1474_v32 = vadd.f32 %v1473_v18, %v1445_v48 }
 0x232   : > { %v1307_v37 = vadd.f32 %v3576_v15, %v1306_v7 }
 0x233   : > { %v1502_v33 = vpop.f32.mrf.mxu1 }
 0x234   : > { %1326 = vst [vmem:[%s3581_s18] sm:$0xff] %v1307_v37  ;;  %v1446_v34 = vpop.f32.mrf.mxu3  ;;  %v1503_v4 = vadd.f32 %v1502_v33, %v1474_v32 }
 0x235   : > { %v1447_v62 = vadd.f32 %v1446_v34, %v3271_v40 }
 0x238   : > { %v1475_v53 = vpop.f32.mrf.mxu0 }
 0x239   : > { %v1308_v61 = vpop.f32.mrf.mxu2 }
 0x23a   : > { %v1309_v26 = vadd.f32 %v3576_v15, %v1308_v61 }
 0x23b   : > { %v1504_v43 = vpop.f32.mrf.mxu1 }
 0x23c   : > { %1327 = vst [vmem:[%s3581_s18 + $0x8] sm:$0xff] %v1309_v26 }
 0x23e   : > { %1646 = vmatmul.bf16.gmra.mxu2 %v2306_v0  ;;  %v1449_v55 = vpop.f32.mrf.mxu3  ;;  %v1476_v0 = vadd.f32 %v1475_v53, %v1447_v62 }
 0x23f   : > { %v1450_v37 = vadd.f32 %v1449_v55, %v3271_v40 }
 0x240   : > { %v1478_v46 = vpop.f32.mrf.mxu0  ;;  %v1505_v31 = vadd.f32 %v1504_v43, %v1476_v0 }
 0x241   : > { %v1311_v2 = vpop.f32.mrf.mxu2 }
 0x242   : > { %v1312_v57 = vadd.f32 %v3576_v15, %v1311_v2 }
 0x243   : > { %v1507_v60 = vpop.f32.mrf.mxu1 }
 0x244   : > { %1328 = vst [vmem:[%s3581_s18 + $0x10] sm:$0xff] %v1312_v57  ;;  %v1479_v57 = vadd.f32 %v1478_v46, %v1450_v37 }
 0x246   : > { %v1451_v27 = vpop.f32.mrf.mxu3  ;;  %v1508_v14 = vadd.f32 %v1507_v60, %v1479_v57 }
 0x247   : > { %v1452_v10 = vadd.f32 %v1451_v27, %v3271_v40 }
 0x248   : > { %v1480_v41 = vpop.f32.mrf.mxu0 }
 0x249   : > { %v1313_v8 = vpop.f32.mrf.mxu2  ;;  %v1481_v29 = vadd.f32 %v1480_v41, %v1452_v10 }
 0x24a   : > { %v1314_v6 = vadd.f32 %v3576_v15, %v1313_v8 }
 0x24b   : > { %v1509_v56 = vpop.f32.mrf.mxu1 }
 0x24c   : > { %1329 = vst [vmem:[%s3581_s18 + $0x18] sm:$0xff] %v1314_v6 }
 0x24e   : > { %1651 = vmatmul.bf16.gmra.mxu2 %v2322_v24  ;;  %v1454_v25 = vpop.f32.mrf.mxu3 }
 0x24f   : > { %v1455_v18 = vadd.f32 %v1454_v25, %v3271_v40 }
 0x250   : > { %v1483_v17 = vpop.f32.mrf.mxu0 }
 0x251   : > { %v1316_v16 = vpop.f32.mrf.mxu2  ;;  %v1484_v34 = vadd.f32 %v1483_v17, %v1455_v18 }
 0x252   : > { %v1317_v39 = vadd.f32 %v3576_v15, %v1316_v16 }
 0x254   : > { %1330 = vst [vmem:[%s3581_s18 + $0x20] sm:$0xff] %v1317_v39  ;;  %v1510_v39 = vadd.f32 %v1509_v56, %v1481_v29 }
 0x256   : > { %v1456_v26 = vpop.f32.mrf.mxu3 }
 0x258   : > { %v1485_v6 = vpop.f32.mrf.mxu0 }
 0x259   : > { %v1318_v38 = vpop.f32.mrf.mxu2 }
 0x25a   : > { %v1319_v12 = vadd.f32 %v3576_v15, %v1318_v38 }
 0x25c   : > { %1331 = vst [vmem:[%s3581_s18 + $0x28] sm:$0xff] %v1319_v12 }
 0x25e   : > { %1656 = vmatmul.bf16.gmra.mxu2 %v2338_v45  ;;  %v1512_v45 = vpop.f32.mrf.mxu1  ;;  %v1555_v11 = vpop.f32.mrf.mxu3 }
 0x25f   : > { %v1513_v21 = vadd.f32 %v1512_v45, %v1484_v34 }
 0x260   : > { %v1584_v12 = vpop.f32.mrf.mxu0 }
 0x261   : > { %v1321_v22 = vpop.f32.mrf.mxu2 }
 0x262   : > { %v1322_v52 = vadd.f32 %v3576_v15, %v1321_v22 }
 0x264   : > { %1332 = vst [vmem:[%s3581_s18 + $0x30] sm:$0xff] %v1322_v52 }
 0x266   : > { %v1514_v16 = vpop.f32.mrf.mxu1 }
 0x268   : > { %v1586_v55 = vpop.f32.mrf.mxu0 }
 0x269   : > { %v1323_v63 = vpop.f32.mrf.mxu2 }
 0x26a   : > { %v1324_v50 = vadd.f32 %v3576_v15, %v1323_v63  ;;  %v1457_v63 = vadd.f32 %v1456_v26, %v3271_v40 }
 0x26c   : > { %1333 = vst [vmem:[%s3581_s18 + $0x38] sm:$0xff] %v1324_v50  ;;  %v1557_v50 = vpop.f32.mrf.mxu3  ;;  %v1486_v43 = vadd.f32 %v1485_v6, %v1457_v63 }
 0x26d   : > { %v1558_v40 = vadd.f32 %v1557_v50, %v3392_v47 }
 0x26e   : > { %v1613_v33 = vpop.f32.mrf.mxu1  ;;  %v1515_v51 = vadd.f32 %v1514_v16, %v1486_v43 }
 0x26f   : > { %v1587_v41 = vadd.f32 %v1586_v55, %v1558_v40 }
 0x270   : > { %v1589_v27 = vpop.f32.mrf.mxu0 }
 0x271   : > { %v1526_v5 = vpop.f32.mrf.mxu2 }
 0x272   : > { %v1527_v1 = vadd.f32 %v1526_v5, %v1498_v9 }
 0x274   : > { %v1662_v44 = vmax.f32 %v1527_v1, 0.0  ;;  %v1560_v19 = vpop.f32.mrf.mxu3 }
 0x275   : > { %v1561_v0 = vadd.f32 %v1560_v19, %v3392_v47 }
 0x276   : > { %v1615_v46 = vpop.f32.mrf.mxu1 }
 0x277   : > { %v1616_v32 = vadd.f32 %v1615_v46, %v1587_v41 }
 0x278   : > { %v1591_v56 = vpop.f32.mrf.mxu0 }
 0x279   : > { %v1528_v54 = vpop.f32.mrf.mxu2 }
 0x27a   : > { %v1529_v30 = vadd.f32 %v1528_v54, %v1500_v36  ;;  %v1556_v36 = vadd.f32 %v1555_v11, %v3392_v47 }
 0x27c   : > { %v1664_v20 = vmax.f32 %v1529_v30, 0.0  ;;  %v1585_v30 = vadd.f32 %v1584_v12, %v1556_v36 }
 0x27e   : > { %v1678_v58 = vpack.c.bf16 %v1664_v20, %v1662_v44  ;;  %v1618_v48 = vpop.f32.mrf.mxu1  ;;  %v1614_v20 = vadd.f32 %v1613_v33, %v1585_v30 }
 0x280   : > { %1694 = vmatmul.bf16.vlgmr.msrb.gmra.mxu3 %v1678_v58  ;;  %v1562_v58 = vpop.f32.mrf.mxu3  ;;  %v1594_v37 = vpop.f32.mrf.mxu0 }
 0x281   : > { %v1531_v59 = vpop.f32.mrf.mxu2  ;;  %v1563_v45 = vadd.f32 %v1562_v58, %v3392_v47 }
 0x282   : > { %v1532_v24 = vadd.f32 %v1531_v59, %v1503_v4 }
 0x283   : > { %v1592_v26 = vadd.f32 %v1591_v56, %v1563_v45 }
 0x284   : > { %v1666_v7 = vmax.f32 %v1532_v24, 0.0 }
 0x289   : > { %v1533_v23 = vpop.f32.mrf.mxu2 }
 0x28a   : > { %v1534_v28 = vadd.f32 %v1533_v23, %v1505_v31  ;;  %v1620_v31 = vpop.f32.mrf.mxu1  ;;  %v1565_v23 = vpop.f32.mrf.mxu3 }
 0x28b   : > { %v1621_v57 = vadd.f32 %v1620_v31, %v1592_v26  ;;  %v1566_v16 = vadd.f32 %v1565_v23, %v3392_v47 }
 0x28c   : > { %v1668_v61 = vmax.f32 %v1534_v28, 0.0  ;;  %v1590_v28 = vadd.f32 %v1589_v27, %v1561_v0 }
 0x28e   : > { %v1680_v2 = vpack.c.bf16 %v1668_v61, %v1666_v7  ;;  %v1619_v61 = vadd.f32 %v1618_v48, %v1590_v28 }
 0x290   : > { %1699 = vmatmul.bf16.gmra.mxu3 %v1680_v2 }
 0x291   : > { %v1536_v8 = vpop.f32.mrf.mxu2 }
 0x292   : > { %v1537_v3 = vadd.f32 %v1536_v8, %v1508_v14  ;;  %v1623_v2 = vpop.f32.mrf.mxu1  ;;  %v1567_v6 = vpop.f32.mrf.mxu3 }
 0x294   : > { %v1670_v35 = vmax.f32 %v1537_v3, 0.0 }
 0x299   : > { %v1538_v38 = vpop.f32.mrf.mxu2 }
 0x29a   : > { %v1539_v42 = vadd.f32 %v1538_v38, %v1510_v39  ;;  %v1596_v39 = vpop.f32.mrf.mxu0  ;;  %v1595_v38 = vadd.f32 %v1594_v37, %v1566_v16  ;;  %v1625_v12 = vpop.f32.mrf.mxu1 }
 0x29b   : > { %v1570_v18 = vpop.f32.mrf.mxu3 }
 0x29c   : > { %v1672_v22 = vmax.f32 %v1539_v42, 0.0  ;;  %v1568_v42 = vadd.f32 %v1567_v6, %v3392_v47  ;;  %v1571_v55 = vadd.f32 %v1570_v18, %v3392_v47 }
 0x29e   : > { %v1682_v52 = vpack.c.bf16 %v1672_v22, %v1670_v35  ;;  %v1624_v22 = vadd.f32 %v1623_v2, %v1595_v38 }
 0x2a0   : > { %1704 = vmatmul.bf16.gmra.mxu3 %v1682_v52  ;;  %v1597_v52 = vadd.f32 %v1596_v39, %v1568_v42 }
 0x2a1   : > { %v1541_v53 = vpop.f32.mrf.mxu2 }
 0x2a2   : > { %v1542_v49 = vadd.f32 %v1541_v53, %v1513_v21  ;;  %v1599_v33 = vpop.f32.mrf.mxu0  ;;  %v1626_v34 = vadd.f32 %v1625_v12, %v1597_v52  ;;  %v1628_v21 = vpop.f32.mrf.mxu1 }
 0x2a3   : > { %v1600_v46 = vadd.f32 %v1599_v33, %v1571_v55 }
 0x2a4   : > { %v1674_v60 = vmax.f32 %v1542_v49, 0.0  ;;  %v1572_v49 = vpop.f32.mrf.mxu3 }
 0x2a5   : > { %v1629_v36 = vadd.f32 %v1628_v21, %v1600_v46 }
 0x2a9   : > { %v1543_v5 = vpop.f32.mrf.mxu2 }
 0x2aa   : > { %v1544_v9 = vadd.f32 %v1543_v5, %v1515_v51  ;;  %v1601_v19 = vpop.f32.mrf.mxu0 }
 0x2ac   : > { %v1676_v1 = vmax.f32 %v1544_v9, 0.0  ;;  %v1573_v9 = vadd.f32 %v1572_v49, %v3392_v47 }
 0x2ae   : > { %v1684_v54 = vpack.c.bf16 %v1676_v1, %v1674_v60  ;;  %v1602_v1 = vadd.f32 %v1601_v19, %v1573_v9 }
 0x2b0   : > { %1709 = vmatmul.bf16.gmra.mxu3 %v1684_v54  ;;  %v1630_v54 = vpop.f32.mrf.mxu1 }
 0x2b1   : > { %v1642_v44 = vpop.f32.mrf.mxu2  ;;  %v1631_v27 = vadd.f32 %v1630_v54, %v1602_v1 }
 0x2b2   : > { %v1643_v62 = vadd.f32 %v1642_v44, %v1614_v20 }
 0x2b4   : > { %v1663_v4 = vmax.f32 %v1643_v62, 0.0 }
 0x2b9   : > { %v1644_v59 = vpop.f32.mrf.mxu2 }
 0x2ba   : > { %v1645_v25 = vadd.f32 %v1644_v59, %v1616_v32 }
 0x2bc   : > { %v1665_v17 = vmax.f32 %v1645_v25, 0.0 }
 0x2be   : > { %v1679_v24 = vpack.c.bf16 %v1665_v17, %v1663_v4 }
 0x2c0   : > { %1723 = vmatmul.bf16.vlgmr.msrb.gmra.mxu0 %v1679_v24 }
 0x2c1   : > { %v1647_v7 = vpop.f32.mrf.mxu2 }
 0x2c2   : > { %v1648_v10 = vadd.f32 %v1647_v7, %v1619_v61 }
 0x2c4   : > { %v1667_v29 = vmax.f32 %v1648_v10, 0.0 }
 0x2c9   : > { %v1649_v8 = vpop.f32.mrf.mxu2 }
 0x2ca   : > { %v1650_v14 = vadd.f32 %v1649_v8, %v1621_v57 }
 0x2cc   : > { %v1669_v11 = vmax.f32 %v1650_v14, 0.0 }
 0x2ce   : > { %v1681_v3 = vpack.c.bf16 %v1669_v11, %v1667_v29 }
 0x2d0   : > { %1728 = vmatmul.bf16.gmra.mxu0 %v1681_v3 }
 0x2d1   : > { %v1652_v35 = vpop.f32.mrf.mxu2 }
 0x2d2   : > { %v1653_v63 = vadd.f32 %v1652_v35, %v1624_v22 }
 0x2d4   : > { %v1671_v43 = vmax.f32 %v1653_v63, 0.0 }
 0x2d9   : > { %v1654_v53 = vpop.f32.mrf.mxu2 }
 0x2da   : > { %v1655_v50 = vadd.f32 %v1654_v53, %v1626_v34 }
 0x2dc   : > { %v1673_v51 = vmax.f32 %v1655_v50, 0.0 }
 0x2de   : > { %v1683_v5 = vpack.c.bf16 %v1673_v51, %v1671_v43 }
 0x2e0   : > { %1733 = vmatmul.bf16.gmra.mxu0 %v1683_v5 }
 0x2e1   : > { %v1657_v60 = vpop.f32.mrf.mxu2 }
 0x2e2   : > { %v1658_v30 = vadd.f32 %v1657_v60, %v1629_v36 }
 0x2e4   : > { %v1675_v48 = vmax.f32 %v1658_v30, 0.0 }
 0x2e9   : > { %v1659_v40 = vpop.f32.mrf.mxu2 }
 0x2ea   : > { %v1660_v44 = vadd.f32 %v1659_v40, %v1631_v27 }
 0x2ec   : > { %v1677_v20 = vmax.f32 %v1660_v44, 0.0 }
 0x2ee   : > { %v1685_v41 = vpack.c.bf16 %v1677_v20, %v1675_v48 }
 0x2f0   : > { %1738 = vmatmul.bf16.gmra.mxu0 %v1685_v41 }
 0x303   : > { %v1695_v58 = vpop.f32.mrf.mxu3 }
 0x304   : > { %v1696_v47 = vadd.f32 %v3473_v13, %v1695_v58 }
 0x30b   : > { %v1697_v32 = vpop.f32.mrf.mxu3 }
 0x30c   : > { %v1698_v56 = vadd.f32 %v3473_v13, %v1697_v32 }
 0x313   : > { %v1700_v59 = vpop.f32.mrf.mxu3 }
 0x314   : > { %v1701_v45 = vadd.f32 %v3473_v13, %v1700_v59 }
 0x31b   : > { %v1702_v24 = vpop.f32.mrf.mxu3 }
 0x31c   : > { %v1703_v37 = vadd.f32 %v3473_v13, %v1702_v24 }
 0x323   : > { %v1705_v7 = vpop.f32.mrf.mxu3 }
 0x324   : > { %v1706_v29 = vadd.f32 %v3473_v13, %v1705_v7 }
 0x32b   : > { %v1707_v6 = vpop.f32.mrf.mxu3 }
 0x32c   : > { %v1708_v16 = vadd.f32 %v3473_v13, %v1707_v6 }
 0x333   : > { %v1710_v38 = vpop.f32.mrf.mxu3 }
 0x334   : > { %v1711_v52 = vadd.f32 %v3473_v13, %v1710_v38 }
 0x33b   : > { %v1712_v22 = vpop.f32.mrf.mxu3 }
 0x33c   : > { %v1713_v33 = vadd.f32 %v3473_v13, %v1712_v22 }
 0x33d   : > { %v1724_v62 = vpop.f32.mrf.mxu0 }
 0x33e   : > { %v1725_v25 = vadd.f32 %v1724_v62, %v1696_v47 }
 0x340   : > { %v1744_v17 = vmax.f32 %v1725_v25, 0.0 }
 0x345   : > { %v1726_v4 = vpop.f32.mrf.mxu0 }
 0x346   : > { %v1727_v0 = vadd.f32 %v1726_v4, %v1698_v56 }
 0x348   : > { %v1745_v31 = vmax.f32 %v1727_v0, 0.0 }
 0x34a   : > { %v1752_v23 = vpack.c.bf16 %v1745_v31, %v1744_v17 }
 0x34c   : > { %1764 = vmatmul.bf16.vlgmr.msrb.gmra.mxu1 %v1752_v23 }
 0x34d   : > { %v1729_v28 = vpop.f32.mrf.mxu0 }
 0x34e   : > { %v1730_v61 = vadd.f32 %v1729_v28, %v1701_v45 }
 0x350   : > { %v1746_v57 = vmax.f32 %v1730_v61, 0.0 }
 0x355   : > { %v1731_v26 = vpop.f32.mrf.mxu0 }
 0x356   : > { %v1732_v2 = vadd.f32 %v1731_v26, %v1703_v37 }
 0x358   : > { %v1747_v10 = vmax.f32 %v1732_v2, 0.0 }
 0x35a   : > { %v1753_v8 = vpack.c.bf16 %v1747_v10, %v1746_v57 }
 0x35c   : > { %1769 = vmatmul.bf16.gmra.mxu1 %v1753_v8 }
 0x35d   : > { %v1734_v14 = vpop.f32.mrf.mxu0 }
 0x35e   : > { %v1735_v11 = vadd.f32 %v1734_v14, %v1706_v29 }
 0x360   : > { %v1748_v42 = vmax.f32 %v1735_v11, 0.0 }
 0x365   : > { %v1736_v39 = vpop.f32.mrf.mxu0 }
 0x366   : > { %v1737_v3 = vadd.f32 %v1736_v39, %v1708_v16 }
 0x368   : > { %v1749_v12 = vmax.f32 %v1737_v3, 0.0 }
 0x36a   : > { %v1754_v35 = vpack.c.bf16 %v1749_v12, %v1748_v42 }
 0x36c   : > { %1774 = vmatmul.bf16.gmra.mxu1 %v1754_v35 }
 0x36d   : > { %v1739_v18 = vpop.f32.mrf.mxu0 }
 0x36e   : > { %v1740_v34 = vadd.f32 %v1739_v18, %v1711_v52 }
 0x370   : > { %v1750_v50 = vmax.f32 %v1740_v34, 0.0 }
 0x375   : > { %v1741_v63 = vpop.f32.mrf.mxu0 }
 0x376   : > { %v1742_v53 = vadd.f32 %v1741_v63, %v1713_v33 }
 0x378   : > { %v1751_v21 = vmax.f32 %v1742_v53, 0.0 }
 0x37a   : > { %v1755_v43 = vpack.c.bf16 %v1751_v21, %v1750_v50 }
 0x37c   : > { %1779 = vmatmul.bf16.gmra.mxu1 %v1755_v43 }
 0x3c9   : > { %v1765_v55 = vpop.f32.mrf.mxu1 }
 0x3ca   : > { %v1766_v51 = vadd.f32 %v3576_v15, %v1765_v55 }
 0x3cc   : > { %1785 = vst [vmem:[%s3581_s18 + $0x40] sm:$0xff] %v1766_v51 }
 0x3d1   : > { %v1767_v49 = vpop.f32.mrf.mxu1 }
 0x3d2   : > { %v1768_v5 = vadd.f32 %v3576_v15, %v1767_v49 }
 0x3d4   : > { %1786 = vst [vmem:[%s3581_s18 + $0x48] sm:$0xff] %v1768_v5 }
 0x3d9   : > { %v1770_v13 = vpop.f32.mrf.mxu1 }
 0x3da   : > { %v1771_v46 = vadd.f32 %v3576_v15, %v1770_v13 }
 0x3dc   : > { %1787 = vst [vmem:[%s3581_s18 + $0x50] sm:$0xff] %v1771_v46 }
 0x3e1   : > { %v1772_v9 = vpop.f32.mrf.mxu1 }
 0x3e2   : > { %v1773_v19 = vadd.f32 %v3576_v15, %v1772_v9 }
 0x3e4   : > { %1788 = vst [vmem:[%s3581_s18 + $0x58] sm:$0xff] %v1773_v19 }
 0x3e9   : > { %v1775_v60 = vpop.f32.mrf.mxu1 }
 0x3ea   : > { %v1776_v36 = vadd.f32 %v3576_v15, %v1775_v60 }
 0x3ec   : > { %1789 = vst [vmem:[%s3581_s18 + $0x60] sm:$0xff] %v1776_v36 }
 0x3f1   : > { %v1777_v1 = vpop.f32.mrf.mxu1 }
 0x3f2   : > { %v1778_v54 = vadd.f32 %v3576_v15, %v1777_v1 }
 0x3f4   : > { %1790 = vst [vmem:[%s3581_s18 + $0x68] sm:$0xff] %v1778_v54 }
 0x3f9   : > { %v1780_v27 = vpop.f32.mrf.mxu1 }
 0x3fa   : > { %v1781_v30 = vadd.f32 %v3576_v15, %v1780_v27 }
 0x3fc   : > { %1791 = vst [vmem:[%s3581_s18 + $0x70] sm:$0xff] %v1781_v30 }
 0x401   : > { %v1782_v40 = vpop.f32.mrf.mxu1 }
 0x402   : > { %v1783_v44 = vadd.f32 %v3576_v15, %v1782_v40 }
 0x404   : > { %1792 = vst [vmem:[%s3581_s18 + $0x78] sm:$0xff] %v1783_v44 }
 0x405 PF: > { %s17_s24 = sadd.s32 1, %s2494_s24  }
 0x406   : > { %p14_p4 = scmp.ge.s32.totalorder %s17_s24, 4  }
 0x408   :  { %16 = sbr.rel (!%p14_p4) target bundleno = 1 (0x1), region = 78 }

</bundles_post_ra>
